<compile_context>
chip_gen: v5e
topology: v5e:2x2
jax: 0.10.0
libtpu: 0.0.40
codegen_flags: <defaults>
</compile_context>

<pallas_src>
import math

import jax
import jax.numpy as jnp
from jax.experimental import pallas as pl
from jax.experimental.pallas import tpu as pltpu

# ----------------- small synthetic BERT config -----------------
VOCAB = 100
TYPE_VOCAB = 2
MAX_POS = 16
HIDDEN = 32
N_LAYERS = 2
N_HEADS = 2
HEAD_DIM = HIDDEN // N_HEADS
INTERMEDIATE = 64
LN_EPS = 1e-12
BATCH = 2
SEQ = 8
N_TOWERS = 2
CLS_PAD = 128            # lane-dense classifier output width (real logits = 2)


# ----------------- in-kernel helpers -----------------
def _layer_norm(x, g, b):
    mu = jnp.mean(x, axis=-1, keepdims=True)
    var = jnp.mean(jnp.square(x - mu), axis=-1, keepdims=True)
    return (x - mu) * jax.lax.rsqrt(var + LN_EPS) * g + b


def _gelu_tanh(y):
    # HF "gelu_new" tanh approximation.
    # TODO(synk): use exact erf-GELU if the checkpoint config specifies hidden_act="gelu".
    return 0.5 * y * (1.0 + jnp.tanh(0.7978845608028654 * (y + 0.044715 * y * y * y)))


# ----------------- fused tower kernel (one grid step == one tower) -----------------
def _tower_kernel(ids_ref, tt_ref, mask_ref,
                  word_emb_ref, pos_emb_ref, type_emb_ref,
                  emb_ln_g_ref, emb_ln_b_ref,
                  wqkv_ref, bqkv_ref, wo_ref, bo_ref,
                  ln1_g_ref, ln1_b_ref,
                  wi_ref, bi_ref, wo2_ref, bo2_ref,
                  ln2_g_ref, ln2_b_ref,
                  pooled_ref):
    B, S = mask_ref.shape[1], mask_ref.shape[2]
    H = HIDDEN
    BS = B * S
    scale = 1.0 / math.sqrt(HEAD_DIM)

    def embed(idx_col, table):
        # embedding gather as one-hot @ table (avoids dynamic-gather lowering)
        n = table.shape[0]
        cols = jax.lax.broadcasted_iota(jnp.int32, (BS, n), 1)
        onehot = (idx_col == cols).astype(jnp.float32)
        return jnp.dot(onehot, table, preferred_element_type=jnp.float32)

    ids = ids_ref[0]                                    # (BS, 1) int32
    tts = tt_ref[0]                                     # (BS, 1) int32
    mask_f = mask_ref[0].astype(jnp.float32)            # (B, S)
    addmask = (1.0 - mask_f) * -10000.0                 # additive attention mask

    # ----- embeddings + LN  (== hidden_states[0]) -----
    emb = embed(ids, word_emb_ref[...]) + embed(tts, type_emb_ref[...])     # (BS, H)
    emb = emb.reshape(B, S, H) + pos_emb_ref[...][:S, :][None, :, :]
    emb = emb.reshape(BS, H)
    h0 = _layer_norm(emb, emb_ln_g_ref[...], emb_ln_b_ref[...])

    # ----- transformer layers (unrolled; stacked weights indexed per layer) -----
    x = h0
    for l in range(N_LAYERS):
        qkv = jnp.dot(x, wqkv_ref[l], preferred_element_type=jnp.float32) + bqkv_ref[l]
        ctx_heads = []
        for h in range(N_HEADS):                        # head split/merge stays in-kernel
            lo = h * HEAD_DIM
            hi = lo + HEAD_DIM
            qh = qkv[:, 0 * H + lo:0 * H + hi].reshape(B, S, HEAD_DIM)
            kh = qkv[:, 1 * H + lo:1 * H + hi].reshape(B, S, HEAD_DIM)
            vh = qkv[:, 2 * H + lo:2 * H + hi].reshape(B, S, HEAD_DIM)
            s = jnp.einsum("bqd,bkd->bqk", qh, kh,
                           preferred_element_type=jnp.float32) * scale
            s = s + addmask[:, None, :]
            s = s - jnp.max(s, axis=-1, keepdims=True)
            p = jnp.exp(s)
            p = p / jnp.sum(p, axis=-1, keepdims=True)
            ctx = jnp.einsum("bqk,bkd->bqd", p, vh,
                             preferred_element_type=jnp.float32)
            ctx_heads.append(ctx.reshape(BS, HEAD_DIM))
        ctx = jnp.concatenate(ctx_heads, axis=-1)                              # (BS, H)

        attn_out = jnp.dot(ctx, wo_ref[l], preferred_element_type=jnp.float32) + bo_ref[l]
        x = _layer_norm(attn_out + x, ln1_g_ref[l], ln1_b_ref[l])

        ff = jnp.dot(x, wi_ref[l], preferred_element_type=jnp.float32) + bi_ref[l]
        ff = _gelu_tanh(ff)
        ff = jnp.dot(ff, wo2_ref[l], preferred_element_type=jnp.float32) + bo2_ref[l]
        x = _layer_norm(ff + x, ln2_g_ref[l], ln2_b_ref[l])

    # ----- masked mean-pool of hidden_states[0] + hidden_states[-1] -----
    hsum = (h0 + x).reshape(B, S, H)
    num = jnp.sum(hsum * mask_f[:, :, None], axis=1)                           # (B, H)
    den = jnp.maximum(jnp.sum(mask_f, axis=1, keepdims=True), 1e-9)            # (B, 1)
    pooled_ref[0] = num / den


# ----------------- classifier kernel (lane-dense padded output) -----------------
def _classifier_kernel(e_ref, w_ref, b_ref, o_ref):
    e1 = e_ref[0]                                       # (B, H)
    e2 = e_ref[1]
    feat = jnp.concatenate([e1, e2, jnp.abs(e1 - e2)], axis=-1)   # (B, 3H)
    o_ref[...] = jnp.dot(feat, w_ref[...], preferred_element_type=jnp.float32) + b_ref[...]


# ----------------- wrappers -----------------
WEIGHT_ORDER = ("word_emb", "pos_emb", "type_emb", "emb_ln_g", "emb_ln_b",
                "wqkv", "bqkv", "wo", "bo", "ln1_g", "ln1_b",
                "wi", "bi", "wo2", "bo2", "ln2_g", "ln2_b")


def _shared_spec(arr):
    nd = arr.ndim
    return pl.BlockSpec(arr.shape, lambda t, _nd=nd: (0,) * _nd)


def encode_towers(packed, ids_all, tt_all, mask_all):
    """Both towers in one pallas_call -> pooled sentence embeddings (2, B, H)."""
    T, BS, _ = ids_all.shape
    B, S = mask_all.shape[1], mask_all.shape[2]
    weights = [packed[k] for k in WEIGHT_ORDER]

    in_specs = [
        pl.BlockSpec((1, BS, 1), lambda t: (t, 0, 0)),   # input ids
        pl.BlockSpec((1, BS, 1), lambda t: (t, 0, 0)),   # token type ids
        pl.BlockSpec((1, B, S), lambda t: (t, 0, 0)),    # attention mask
    ] + [_shared_spec(w) for w in weights]

    return pl.pallas_call(
        _tower_kernel,
        grid=(T,),
        in_specs=in_specs,
        out_specs=pl.BlockSpec((1, B, HIDDEN), lambda t: (t, 0, 0)),
        out_shape=jax.ShapeDtypeStruct((T, B, HIDDEN), jnp.float32),
        compiler_params=pltpu.CompilerParams(
            dimension_semantics=("parallel",)),          # v7x: one tower per TensorCore
    )(ids_all, tt_all, mask_all, *weights)


def classify(pooled, cls_w_pad, cls_b_pad):
    B = pooled.shape[1]
    logits_pad = pl.pallas_call(
        _classifier_kernel,
        in_specs=[pl.BlockSpec(memory_space=pltpu.MemorySpace.VMEM)] * 3,
        out_specs=pl.BlockSpec(memory_space=pltpu.MemorySpace.VMEM),
        out_shape=jax.ShapeDtypeStruct((B, CLS_PAD), jnp.float32),
    )(pooled, cls_w_pad, cls_b_pad)
    return logits_pad[:, :2]


@jax.jit
def tower_encoder_forward(packed,
                          input_ids1, attention_mask1, token_type_ids1,
                          input_ids2, attention_mask2, token_type_ids2):
    B, S = input_ids1.shape
    ids_all = jnp.stack([input_ids1, input_ids2]).reshape(N_TOWERS, B * S, 1).astype(jnp.int32)
    tt_all = jnp.stack([token_type_ids1, token_type_ids2]).reshape(N_TOWERS, B * S, 1).astype(jnp.int32)
    mask_all = jnp.stack([attention_mask1, attention_mask2]).astype(jnp.int32)
    pooled = encode_towers(packed, ids_all, tt_all, mask_all)                  # (2, B, H)
    return classify(pooled, packed["cls_w_pad"], packed["cls_b_pad"])          # (B, 2)


# ----------------- deterministic parameter init + packing -----------------
def init_params(key):
    """Per-layer parameter dict mirroring HF BERT layout (synthetic weights)."""
    keys = jax.random.split(key, 64)
    it = iter(keys)

    def nrm(shape, scale=0.02):
        return (scale * jax.random.normal(next(it), shape)).astype(jnp.float32)

    params = {
        "word_emb": nrm((VOCAB, HIDDEN)),
        "pos_emb": nrm((MAX_POS, HIDDEN)),
        "type_emb": nrm((TYPE_VOCAB, HIDDEN)),
        "emb_ln_g": jnp.ones((HIDDEN,), jnp.float32),
        "emb_ln_b": jnp.zeros((HIDDEN,), jnp.float32),
        "layers": [],
        "cls_w": nrm((3 * HIDDEN, 2)),
        "cls_b": jnp.zeros((2,), jnp.float32),
    }
    for _ in range(N_LAYERS):
        params["layers"].append({
            "wq": nrm((HIDDEN, HIDDEN)), "bq": jnp.zeros((HIDDEN,), jnp.float32),
            "wk": nrm((HIDDEN, HIDDEN)), "bk": jnp.zeros((HIDDEN,), jnp.float32),
            "wv": nrm((HIDDEN, HIDDEN)), "bv": jnp.zeros((HIDDEN,), jnp.float32),
            "wo": nrm((HIDDEN, HIDDEN)), "bo": jnp.zeros((HIDDEN,), jnp.float32),
            "ln1_g": jnp.ones((HIDDEN,), jnp.float32),
            "ln1_b": jnp.zeros((HIDDEN,), jnp.float32),
            "wi": nrm((HIDDEN, INTERMEDIATE)), "bi": jnp.zeros((INTERMEDIATE,), jnp.float32),
            "wo2": nrm((INTERMEDIATE, HIDDEN)), "bo2": jnp.zeros((HIDDEN,), jnp.float32),
            "ln2_g": jnp.ones((HIDDEN,), jnp.float32),
            "ln2_b": jnp.zeros((HIDDEN,), jnp.float32),
        })
    return params


def pack_params(params):
    """Stack per-layer weights into (N_LAYERS, ...), merge QKV, pad classifier (done once)."""
    L = params["layers"]

    def stack(fn):
        return jnp.stack([fn(lp) for lp in L])

    return {
        "word_emb": params["word_emb"],
        "pos_emb": params["pos_emb"],
        "type_emb": params["type_emb"],
        "emb_ln_g": params["emb_ln_g"].reshape(1, HIDDEN),
        "emb_ln_b": params["emb_ln_b"].reshape(1, HIDDEN),
        # merged QKV projection
        "wqkv": stack(lambda lp: jnp.concatenate([lp["wq"], lp["wk"], lp["wv"]], axis=1)),
        "bqkv": stack(lambda lp: jnp.concatenate(
            [lp["bq"], lp["bk"], lp["bv"]]).reshape(1, 3 * HIDDEN)),
        "wo": stack(lambda lp: lp["wo"]),
        "bo": stack(lambda lp: lp["bo"].reshape(1, HIDDEN)),
        "ln1_g": stack(lambda lp: lp["ln1_g"].reshape(1, HIDDEN)),
        "ln1_b": stack(lambda lp: lp["ln1_b"].reshape(1, HIDDEN)),
        "wi": stack(lambda lp: lp["wi"]),
        "bi": stack(lambda lp: lp["bi"].reshape(1, INTERMEDIATE)),
        "wo2": stack(lambda lp: lp["wo2"]),
        "bo2": stack(lambda lp: lp["bo2"].reshape(1, HIDDEN)),
        "ln2_g": stack(lambda lp: lp["ln2_g"].reshape(1, HIDDEN)),
        "ln2_b": stack(lambda lp: lp["ln2_b"].reshape(1, HIDDEN)),
        # classifier zero-padded to a lane-dense 128-wide output
        "cls_w_pad": jnp.zeros((3 * HIDDEN, CLS_PAD), jnp.float32).at[:, :2].set(params["cls_w"]),
        "cls_b_pad": jnp.zeros((1, CLS_PAD), jnp.float32).at[:, :2].set(params["cls_b"]),
    }


if __name__ == "__main__":
    key = jax.random.PRNGKey(0)
    pkey, dkey = jax.random.split(key)
    params = init_params(pkey)
    packed = pack_params(params)

    k1, k2 = jax.random.split(dkey)
    input_ids1 = jax.random.randint(k1, (BATCH, SEQ), 0, VOCAB, dtype=jnp.int32)
    input_ids2 = jax.random.randint(k2, (BATCH, SEQ), 0, VOCAB, dtype=jnp.int32)
    pos = jnp.arange(SEQ)[None, :]
    attention_mask1 = (pos < jnp.array([[SEQ], [SEQ - 3]])).astype(jnp.int32)
    attention_mask2 = (pos < jnp.array([[SEQ - 2], [SEQ]])).astype(jnp.int32)
    token_type_ids1 = jnp.zeros((BATCH, SEQ), jnp.int32)
    token_type_ids2 = jnp.zeros((BATCH, SEQ), jnp.int32)

    logits = tower_encoder_forward(
        packed,
        input_ids1, attention_mask1, token_type_ids1,
        input_ids2, attention_mask2, token_type_ids2)
    jax.block_until_ready(logits)
    assert logits.shape == (BATCH, 2) and logits.dtype == jnp.float32
    print("KERNEL_OK")
</pallas_src>

<mosaic_0001>
module attributes {stable_mosaic.version = 11 : i64} {
  func.func @_classifier_kernel(%arg0: memref<2x2x32xf32, #tpu.memory_space<vmem>>, %arg1: memref<96x128xf32, #tpu.memory_space<vmem>>, %arg2: memref<1x128xf32, #tpu.memory_space<vmem>>, %arg3: memref<2x128xf32, #tpu.memory_space<vmem>>) attributes {dimension_semantics = [], scalar_prefetch = 0 : i64, scratch_operands = 0 : i64, tpu.core_type = #tpu.core_type<tc>} {
    %c0 = arith.constant 0 : index
    %c0_0 = arith.constant 0 : index
    %c0_1 = arith.constant 0 : index
    %0 = vector.load %arg0[%c0, %c0_0, %c0_1] : memref<2x2x32xf32, #tpu.memory_space<vmem>>, vector<1x2x32xf32>
    %1 = vector.shape_cast %0 : vector<1x2x32xf32> to vector<2x32xf32>
    %c1 = arith.constant 1 : index
    %c0_2 = arith.constant 0 : index
    %c0_3 = arith.constant 0 : index
    %2 = vector.load %arg0[%c1, %c0_2, %c0_3] : memref<2x2x32xf32, #tpu.memory_space<vmem>>, vector<1x2x32xf32>
    %3 = vector.shape_cast %2 : vector<1x2x32xf32> to vector<2x32xf32>
    %4 = arith.subf %1, %3 : vector<2x32xf32>
    %5 = math.absf %4 : vector<2x32xf32>
    %6 = tpu.concatenate %1, %3, %5 in 1 : vector<2x32xf32>, vector<2x32xf32>, vector<2x32xf32> -> vector<2x96xf32>
    %c0_4 = arith.constant 0 : index
    %c0_5 = arith.constant 0 : index
    %7 = vector.load %arg1[%c0_4, %c0_5] : memref<96x128xf32, #tpu.memory_space<vmem>>, vector<96x128xf32>
    %cst = arith.constant dense<0.000000e+00> : vector<2x128xf32>
    %8 = tpu.matmul %6, %7, %cst {dimension_numbers = #tpu.dot_dimension_numbers<[1], [0], [0], [1], [0, 0, 1, 1], [], []>} : vector<2x96xf32>, vector<96x128xf32>, vector<2x128xf32> -> vector<2x128xf32>
    %c0_6 = arith.constant 0 : index
    %c0_7 = arith.constant 0 : index
    %9 = vector.load %arg2[%c0_6, %c0_7] : memref<1x128xf32, #tpu.memory_space<vmem>>, vector<1x128xf32>
    %10 = vector.broadcast %9 : vector<1x128xf32> to vector<2x128xf32>
    %11 = arith.addf %8, %10 : vector<2x128xf32>
    %c0_8 = arith.constant 0 : index
    %c0_9 = arith.constant 0 : index
    %12 = vector.load %arg3[%c0_8, %c0_9] : memref<2x128xf32, #tpu.memory_space<vmem>>, vector<2x128xf32>
    tpu.vector_store %arg3[%c0_8, %c0_9], %11 {strides = array<i32>} : memref<2x128xf32, #tpu.memory_space<vmem>>, vector<2x128xf32>,
    return
  }
}

module attributes {stable_mosaic.version = 11 : i64} {
  func.func @_tower_kernel(%arg0: i32, %arg1: memref<1x16x1xi32, #tpu.memory_space<vmem>>, %arg2: memref<1x16x1xi32, #tpu.memory_space<vmem>>, %arg3: memref<1x2x8xi32, #tpu.memory_space<vmem>>, %arg4: memref<100x32xf32, #tpu.memory_space<vmem>>, %arg5: memref<16x32xf32, #tpu.memory_space<vmem>>, %arg6: memref<2x32xf32, #tpu.memory_space<vmem>>, %arg7: memref<1x32xf32, #tpu.memory_space<vmem>>, %arg8: memref<1x32xf32, #tpu.memory_space<vmem>>, %arg9: memref<2x32x96xf32, #tpu.memory_space<vmem>>, %arg10: memref<2x1x96xf32, #tpu.memory_space<vmem>>, %arg11: memref<2x32x32xf32, #tpu.memory_space<vmem>>, %arg12: memref<2x1x32xf32, #tpu.memory_space<vmem>>, %arg13: memref<2x1x32xf32, #tpu.memory_space<vmem>>, %arg14: memref<2x1x32xf32, #tpu.memory_space<vmem>>, %arg15: memref<2x32x64xf32, #tpu.memory_space<vmem>>, %arg16: memref<2x1x64xf32, #tpu.memory_space<vmem>>, %arg17: memref<2x64x32xf32, #tpu.memory_space<vmem>>, %arg18: memref<2x1x32xf32, #tpu.memory_space<vmem>>, %arg19: memref<2x1x32xf32, #tpu.memory_space<vmem>>, %arg20: memref<2x1x32xf32, #tpu.memory_space<vmem>>, %arg21: memref<1x2x32xf32, #tpu.memory_space<vmem>>) attributes {dimension_semantics = [#tpu.dimension_semantics<parallel>], iteration_bounds = array<i64: 2>, scalar_prefetch = 0 : i64, scratch_operands = 0 : i64, tpu.core_type = #tpu.core_type<tc>, window_params = [{transform_indices = @transform_0, window_bounds = array<i64: 1, 16, 1>}, {transform_indices = @transform_1, window_bounds = array<i64: 1, 16, 1>}, {transform_indices = @transform_2, window_bounds = array<i64: 1, 2, 8>}, {pipeline_mode = #tpu.pipeline_mode<synchronous>, transform_indices = @transform_3, window_bounds = array<i64: 100, 32>}, {pipeline_mode = #tpu.pipeline_mode<synchronous>, transform_indices = @transform_4, window_bounds = array<i64: 16, 32>}, {pipeline_mode = #tpu.pipeline_mode<synchronous>, transform_indices = @transform_5, window_bounds = array<i64: 2, 32>}, {pipeline_mode = #tpu.pipeline_mode<synchronous>, transform_indices = @transform_6, window_bounds = array<i64: 1, 32>}, {pipeline_mode = #tpu.pipeline_mode<synchronous>, transform_indices = @transform_7, window_bounds = array<i64: 1, 32>}, {pipeline_mode = #tpu.pipeline_mode<synchronous>, transform_indices = @transform_8, window_bounds = array<i64: 2, 32, 96>}, {pipeline_mode = #tpu.pipeline_mode<synchronous>, transform_indices = @transform_9, window_bounds = array<i64: 2, 1, 96>}, {pipeline_mode = #tpu.pipeline_mode<synchronous>, transform_indices = @transform_10, window_bounds = array<i64: 2, 32, 32>}, {pipeline_mode = #tpu.pipeline_mode<synchronous>, transform_indices = @transform_11, window_bounds = array<i64: 2, 1, 32>}, {pipeline_mode = #tpu.pipeline_mode<synchronous>, transform_indices = @transform_12, window_bounds = array<i64: 2, 1, 32>}, {pipeline_mode = #tpu.pipeline_mode<synchronous>, transform_indices = @transform_13, window_bounds = array<i64: 2, 1, 32>}, {pipeline_mode = #tpu.pipeline_mode<synchronous>, transform_indices = @transform_14, window_bounds = array<i64: 2, 32, 64>}, {pipeline_mode = #tpu.pipeline_mode<synchronous>, transform_indices = @transform_15, window_bounds = array<i64: 2, 1, 64>}, {pipeline_mode = #tpu.pipeline_mode<synchronous>, transform_indices = @transform_16, window_bounds = array<i64: 2, 64, 32>}, {pipeline_mode = #tpu.pipeline_mode<synchronous>, transform_indices = @transform_17, window_bounds = array<i64: 2, 1, 32>}, {pipeline_mode = #tpu.pipeline_mode<synchronous>, transform_indices = @transform_18, window_bounds = array<i64: 2, 1, 32>}, {pipeline_mode = #tpu.pipeline_mode<synchronous>, transform_indices = @transform_19, window_bounds = array<i64: 2, 1, 32>}, {transform_indices = @transform_20, window_bounds = array<i64: 1, 2, 32>}]} {
    %c0 = arith.constant 0 : index
    %c0_0 = arith.constant 0 : index
    %c0_1 = arith.constant 0 : index
    %0 = vector.load %arg1[%c0, %c0_0, %c0_1] : memref<1x16x1xi32, #tpu.memory_space<vmem>>, vector<1x16x1xi32>
    %1 = vector.shape_cast %0 : vector<1x16x1xi32> to vector<16x1xi32>
    %c0_2 = arith.constant 0 : index
    %c0_3 = arith.constant 0 : index
    %c0_4 = arith.constant 0 : index
    %2 = vector.load %arg2[%c0_2, %c0_3, %c0_4] : memref<1x16x1xi32, #tpu.memory_space<vmem>>, vector<1x16x1xi32>
    %3 = vector.shape_cast %2 : vector<1x16x1xi32> to vector<16x1xi32>
    %c0_5 = arith.constant 0 : index
    %c0_6 = arith.constant 0 : index
    %c0_7 = arith.constant 0 : index
    %4 = vector.load %arg3[%c0_5, %c0_6, %c0_7] : memref<1x2x8xi32, #tpu.memory_space<vmem>>, vector<1x2x8xi32>
    %5 = vector.shape_cast %4 : vector<1x2x8xi32> to vector<2x8xi32>
    %6 = arith.sitofp %5 : vector<2x8xi32> to vector<2x8xf32>
    %cst = arith.constant 1.000000e+00 : f32
    %7 = vector.broadcast %cst : f32 to vector<2x8xf32>
    %8 = arith.subf %7, %6 : vector<2x8xf32>
    %cst_8 = arith.constant -1.000000e+04 : f32
    %9 = vector.broadcast %cst_8 : f32 to vector<2x8xf32>
    %10 = arith.mulf %8, %9 : vector<2x8xf32>
    %c0_9 = arith.constant 0 : index
    %c0_10 = arith.constant 0 : index
    %11 = vector.load %arg4[%c0_9, %c0_10] : memref<100x32xf32, #tpu.memory_space<vmem>>, vector<100x32xf32>
    %12 = tpu.iota {dimensions = array<i32: 1>} : vector<16x100xi32>
    %13 = vector.broadcast %1 : vector<16x1xi32> to vector<16x100xi32>
    %14 = arith.cmpi eq, %13, %12 : vector<16x100xi32>
    %15 = arith.extui %14 : vector<16x100xi1> to vector<16x100xi32>
    %16 = arith.sitofp %15 : vector<16x100xi32> to vector<16x100xf32>
    %cst_11 = arith.constant dense<0.000000e+00> : vector<16x32xf32>
    %17 = tpu.matmul %16, %11, %cst_11 {dimension_numbers = #tpu.dot_dimension_numbers<[1], [0], [0], [1], [0, 0, 1, 1], [], []>} : vector<16x100xf32>, vector<100x32xf32>, vector<16x32xf32> -> vector<16x32xf32>
    %c0_12 = arith.constant 0 : index
    %c0_13 = arith.constant 0 : index
    %18 = vector.load %arg6[%c0_12, %c0_13] : memref<2x32xf32, #tpu.memory_space<vmem>>, vector<2x32xf32>
    %19 = tpu.iota {dimensions = array<i32: 1>} : vector<16x2xi32>
    %20 = vector.broadcast %3 : vector<16x1xi32> to vector<16x2xi32>
    %21 = arith.cmpi eq, %20, %19 : vector<16x2xi32>
    %22 = arith.extui %21 : vector<16x2xi1> to vector<16x2xi32>
    %23 = arith.sitofp %22 : vector<16x2xi32> to vector<16x2xf32>
    %cst_14 = arith.constant dense<0.000000e+00> : vector<16x32xf32>
    %24 = tpu.matmul %23, %18, %cst_14 {dimension_numbers = #tpu.dot_dimension_numbers<[1], [0], [0], [1], [0, 0, 1, 1], [], []>} : vector<16x2xf32>, vector<2x32xf32>, vector<16x32xf32> -> vector<16x32xf32>
    %25 = arith.addf %17, %24 : vector<16x32xf32>
    %26 = vector.shape_cast %25 : vector<16x32xf32> to vector<2x8x32xf32>
    %c0_15 = arith.constant 0 : index
    %c0_16 = arith.constant 0 : index
    %27 = vector.load %arg5[%c0_15, %c0_16] : memref<16x32xf32, #tpu.memory_space<vmem>>, vector<16x32xf32>
    %28 = vector.extract_strided_slice %27 {offsets = [0, 0], sizes = [8, 32], strides = [1, 1]} : vector<16x32xf32> to vector<8x32xf32>
    %29 = vector.shape_cast %28 : vector<8x32xf32> to vector<1x8x32xf32>
    %30 = vector.broadcast %29 : vector<1x8x32xf32> to vector<2x8x32xf32>
    %31 = arith.addf %26, %30 : vector<2x8x32xf32>
    %32 = vector.shape_cast %31 : vector<2x8x32xf32> to vector<16x32xf32>
    %c0_17 = arith.constant 0 : index
    %c0_18 = arith.constant 0 : index
    %33 = vector.load %arg7[%c0_17, %c0_18] : memref<1x32xf32, #tpu.memory_space<vmem>>, vector<1x32xf32>
    %c0_19 = arith.constant 0 : index
    %c0_20 = arith.constant 0 : index
    %34 = vector.load %arg8[%c0_19, %c0_20] : memref<1x32xf32, #tpu.memory_space<vmem>>, vector<1x32xf32>
    %cst_21 = arith.constant dense<0.000000e+00> : vector<16xf32>
    %35 = vector.multi_reduction <add>, %32, %cst_21 [1] : vector<16x32xf32> to vector<16xf32>
    %36 = vector.shape_cast %35 : vector<16xf32> to vector<16x1xf32>
    %cst_22 = arith.constant 3.200000e+01 : f32
    %37 = vector.broadcast %cst_22 : f32 to vector<16x1xf32>
    %38 = arith.divf %36, %37 : vector<16x1xf32>
    %39 = vector.broadcast %38 : vector<16x1xf32> to vector<16x32xf32>
    %40 = arith.subf %32, %39 : vector<16x32xf32>
    %41 = arith.mulf %40, %40 : vector<16x32xf32>
    %cst_23 = arith.constant dense<0.000000e+00> : vector<16xf32>
    %42 = vector.multi_reduction <add>, %41, %cst_23 [1] : vector<16x32xf32> to vector<16xf32>
    %43 = vector.shape_cast %42 : vector<16xf32> to vector<16x1xf32>
    %cst_24 = arith.constant 3.200000e+01 : f32
    %44 = vector.broadcast %cst_24 : f32 to vector<16x1xf32>
    %45 = arith.divf %43, %44 : vector<16x1xf32>
    %46 = vector.broadcast %38 : vector<16x1xf32> to vector<16x32xf32>
    %47 = arith.subf %32, %46 : vector<16x32xf32>
    %cst_25 = arith.constant 9.99999996E-13 : f32
    %48 = vector.broadcast %cst_25 : f32 to vector<16x1xf32>
    %49 = arith.addf %45, %48 : vector<16x1xf32>
    %50 = math.rsqrt %49 : vector<16x1xf32>
    %51 = vector.broadcast %50 : vector<16x1xf32> to vector<16x32xf32>
    %52 = arith.mulf %47, %51 : vector<16x32xf32>
    %53 = vector.broadcast %33 : vector<1x32xf32> to vector<16x32xf32>
    %54 = arith.mulf %52, %53 : vector<16x32xf32>
    %55 = vector.broadcast %34 : vector<1x32xf32> to vector<16x32xf32>
    %56 = arith.addf %54, %55 : vector<16x32xf32>
    %c0_26 = arith.constant 0 : index
    %c0_27 = arith.constant 0 : index
    %c0_28 = arith.constant 0 : index
    %57 = vector.load %arg9[%c0_26, %c0_27, %c0_28] : memref<2x32x96xf32, #tpu.memory_space<vmem>>, vector<1x32x96xf32>
    %58 = vector.shape_cast %57 : vector<1x32x96xf32> to vector<32x96xf32>
    %cst_29 = arith.constant dense<0.000000e+00> : vector<16x96xf32>
    %59 = tpu.matmul %56, %58, %cst_29 {dimension_numbers = #tpu.dot_dimension_numbers<[1], [0], [0], [1], [0, 0, 1, 1], [], []>} : vector<16x32xf32>, vector<32x96xf32>, vector<16x96xf32> -> vector<16x96xf32>
    %c0_30 = arith.constant 0 : index
    %c0_31 = arith.constant 0 : index
    %c0_32 = arith.constant 0 : index
    %60 = vector.load %arg10[%c0_30, %c0_31, %c0_32] : memref<2x1x96xf32, #tpu.memory_space<vmem>>, vector<1x1x96xf32>
    %61 = vector.shape_cast %60 : vector<1x1x96xf32> to vector<1x96xf32>
    %62 = vector.broadcast %61 : vector<1x96xf32> to vector<16x96xf32>
    %63 = arith.addf %59, %62 : vector<16x96xf32>
    %64 = vector.extract_strided_slice %63 {offsets = [0, 0], sizes = [16, 16], strides = [1, 1]} : vector<16x96xf32> to vector<16x16xf32>
    %65 = vector.shape_cast %64 : vector<16x16xf32> to vector<2x8x16xf32>
    %66 = vector.extract_strided_slice %63 {offsets = [0, 32], sizes = [16, 16], strides = [1, 1]} : vector<16x96xf32> to vector<16x16xf32>
    %67 = vector.shape_cast %66 : vector<16x16xf32> to vector<2x8x16xf32>
    %68 = vector.extract_strided_slice %63 {offsets = [0, 64], sizes = [16, 16], strides = [1, 1]} : vector<16x96xf32> to vector<16x16xf32>
    %69 = vector.shape_cast %68 : vector<16x16xf32> to vector<2x8x16xf32>
    "tpu.trace_start"() <{level = 10 : i32, message = "bqd,bkd->bqk"}> : () -> ()
    %cst_33 = arith.constant dense<0.000000e+00> : vector<2x8x8xf32>
    %70 = tpu.matmul %65, %67, %cst_33 {dimension_numbers = #tpu.dot_dimension_numbers<[2], [2], [1], [1], [0, 0, 0, 1, 1, 1], [0], [0]>} : vector<2x8x16xf32>, vector<2x8x16xf32>, vector<2x8x8xf32> -> vector<2x8x8xf32>
    "tpu.trace_stop"() : () -> ()
    %cst_34 = arith.constant 2.500000e-01 : f32
    %71 = vector.broadcast %cst_34 : f32 to vector<2x8x8xf32>
    %72 = arith.mulf %70, %71 : vector<2x8x8xf32>
    %73 = vector.shape_cast %10 : vector<2x8xf32> to vector<2x1x8xf32>
    %74 = vector.broadcast %73 : vector<2x1x8xf32> to vector<2x8x8xf32>
    %75 = arith.addf %72, %74 : vector<2x8x8xf32>
    %cst_35 = arith.constant dense<0xFF800000> : vector<2x8xf32>
    %76 = vector.multi_reduction <maximumf>, %75, %cst_35 [2] : vector<2x8x8xf32> to vector<2x8xf32>
    %77 = vector.shape_cast %76 : vector<2x8xf32> to vector<2x8x1xf32>
    %78 = vector.broadcast %77 : vector<2x8x1xf32> to vector<2x8x8xf32>
    %79 = arith.subf %75, %78 : vector<2x8x8xf32>
    %80 = math.exp %79 : vector<2x8x8xf32>
    %cst_36 = arith.constant dense<0.000000e+00> : vector<2x8xf32>
    %81 = vector.multi_reduction <add>, %80, %cst_36 [2] : vector<2x8x8xf32> to vector<2x8xf32>
    %82 = vector.shape_cast %81 : vector<2x8xf32> to vector<2x8x1xf32>
    %83 = vector.broadcast %82 : vector<2x8x1xf32> to vector<2x8x8xf32>
    %84 = arith.divf %80, %83 : vector<2x8x8xf32>
    "tpu.trace_start"() <{level = 10 : i32, message = "bqk,bkd->bqd"}> : () -> ()
    %cst_37 = arith.constant dense<0.000000e+00> : vector<2x8x16xf32>
    %85 = tpu.matmul %84, %69, %cst_37 {dimension_numbers = #tpu.dot_dimension_numbers<[2], [1], [1], [2], [0, 0, 0, 1, 1, 2], [0], [0]>} : vector<2x8x8xf32>, vector<2x8x16xf32>, vector<2x8x16xf32> -> vector<2x8x16xf32>
    "tpu.trace_stop"() : () -> ()
    %86 = vector.shape_cast %85 : vector<2x8x16xf32> to vector<16x16xf32>
    %87 = vector.extract_strided_slice %63 {offsets = [0, 16], sizes = [16, 16], strides = [1, 1]} : vector<16x96xf32> to vector<16x16xf32>
    %88 = vector.shape_cast %87 : vector<16x16xf32> to vector<2x8x16xf32>
    %89 = vector.extract_strided_slice %63 {offsets = [0, 48], sizes = [16, 16], strides = [1, 1]} : vector<16x96xf32> to vector<16x16xf32>
    %90 = vector.shape_cast %89 : vector<16x16xf32> to vector<2x8x16xf32>
    %91 = vector.extract_strided_slice %63 {offsets = [0, 80], sizes = [16, 16], strides = [1, 1]} : vector<16x96xf32> to vector<16x16xf32>
    %92 = vector.shape_cast %91 : vector<16x16xf32> to vector<2x8x16xf32>
    "tpu.trace_start"() <{level = 10 : i32, message = "bqd,bkd->bqk"}> : () -> ()
    %cst_38 = arith.constant dense<0.000000e+00> : vector<2x8x8xf32>
    %93 = tpu.matmul %88, %90, %cst_38 {dimension_numbers = #tpu.dot_dimension_numbers<[2], [2], [1], [1], [0, 0, 0, 1, 1, 1], [0], [0]>} : vector<2x8x16xf32>, vector<2x8x16xf32>, vector<2x8x8xf32> -> vector<2x8x8xf32>
    "tpu.trace_stop"() : () -> ()
    %cst_39 = arith.constant 2.500000e-01 : f32
    %94 = vector.broadcast %cst_39 : f32 to vector<2x8x8xf32>
    %95 = arith.mulf %93, %94 : vector<2x8x8xf32>
    %96 = vector.shape_cast %10 : vector<2x8xf32> to vector<2x1x8xf32>
    %97 = vector.broadcast %96 : vector<2x1x8xf32> to vector<2x8x8xf32>
    %98 = arith.addf %95, %97 : vector<2x8x8xf32>
    %cst_40 = arith.constant dense<0xFF800000> : vector<2x8xf32>
    %99 = vector.multi_reduction <maximumf>, %98, %cst_40 [2] : vector<2x8x8xf32> to vector<2x8xf32>
    %100 = vector.shape_cast %99 : vector<2x8xf32> to vector<2x8x1xf32>
    %101 = vector.broadcast %100 : vector<2x8x1xf32> to vector<2x8x8xf32>
    %102 = arith.subf %98, %101 : vector<2x8x8xf32>
    %103 = math.exp %102 : vector<2x8x8xf32>
    %cst_41 = arith.constant dense<0.000000e+00> : vector<2x8xf32>
    %104 = vector.multi_reduction <add>, %103, %cst_41 [2] : vector<2x8x8xf32> to vector<2x8xf32>
    %105 = vector.shape_cast %104 : vector<2x8xf32> to vector<2x8x1xf32>
    %106 = vector.broadcast %105 : vector<2x8x1xf32> to vector<2x8x8xf32>
    %107 = arith.divf %103, %106 : vector<2x8x8xf32>
    "tpu.trace_start"() <{level = 10 : i32, message = "bqk,bkd->bqd"}> : () -> ()
    %cst_42 = arith.constant dense<0.000000e+00> : vector<2x8x16xf32>
    %108 = tpu.matmul %107, %92, %cst_42 {dimension_numbers = #tpu.dot_dimension_numbers<[2], [1], [1], [2], [0, 0, 0, 1, 1, 2], [0], [0]>} : vector<2x8x8xf32>, vector<2x8x16xf32>, vector<2x8x16xf32> -> vector<2x8x16xf32>
    "tpu.trace_stop"() : () -> ()
    %109 = vector.shape_cast %108 : vector<2x8x16xf32> to vector<16x16xf32>
    %110 = tpu.concatenate %86, %109 in 1 : vector<16x16xf32>, vector<16x16xf32> -> vector<16x32xf32>
    %c0_43 = arith.constant 0 : index
    %c0_44 = arith.constant 0 : index
    %c0_45 = arith.constant 0 : index
    %111 = vector.load %arg11[%c0_43, %c0_44, %c0_45] : memref<2x32x32xf32, #tpu.memory_space<vmem>>, vector<1x32x32xf32>
    %112 = vector.shape_cast %111 : vector<1x32x32xf32> to vector<32x32xf32>
    %cst_46 = arith.constant dense<0.000000e+00> : vector<16x32xf32>
    %113 = tpu.matmul %110, %112, %cst_46 {dimension_numbers = #tpu.dot_dimension_numbers<[1], [0], [0], [1], [0, 0, 1, 1], [], []>} : vector<16x32xf32>, vector<32x32xf32>, vector<16x32xf32> -> vector<16x32xf32>
    %c0_47 = arith.constant 0 : index
    %c0_48 = arith.constant 0 : index
    %c0_49 = arith.constant 0 : index
    %114 = vector.load %arg12[%c0_47, %c0_48, %c0_49] : memref<2x1x32xf32, #tpu.memory_space<vmem>>, vector<1x1x32xf32>
    %115 = vector.shape_cast %114 : vector<1x1x32xf32> to vector<1x32xf32>
    %116 = vector.broadcast %115 : vector<1x32xf32> to vector<16x32xf32>
    %117 = arith.addf %113, %116 : vector<16x32xf32>
    %118 = arith.addf %117, %56 : vector<16x32xf32>
    %c0_50 = arith.constant 0 : index
    %c0_51 = arith.constant 0 : index
    %c0_52 = arith.constant 0 : index
    %119 = vector.load %arg13[%c0_50, %c0_51, %c0_52] : memref<2x1x32xf32, #tpu.memory_space<vmem>>, vector<1x1x32xf32>
    %120 = vector.shape_cast %119 : vector<1x1x32xf32> to vector<1x32xf32>
    %c0_53 = arith.constant 0 : index
    %c0_54 = arith.constant 0 : index
    %c0_55 = arith.constant 0 : index
    %121 = vector.load %arg14[%c0_53, %c0_54, %c0_55] : memref<2x1x32xf32, #tpu.memory_space<vmem>>, vector<1x1x32xf32>
    %122 = vector.shape_cast %121 : vector<1x1x32xf32> to vector<1x32xf32>
    %cst_56 = arith.constant dense<0.000000e+00> : vector<16xf32>
    %123 = vector.multi_reduction <add>, %118, %cst_56 [1] : vector<16x32xf32> to vector<16xf32>
    %124 = vector.shape_cast %123 : vector<16xf32> to vector<16x1xf32>
    %cst_57 = arith.constant 3.200000e+01 : f32
    %125 = vector.broadcast %cst_57 : f32 to vector<16x1xf32>
    %126 = arith.divf %124, %125 : vector<16x1xf32>
    %127 = vector.broadcast %126 : vector<16x1xf32> to vector<16x32xf32>
    %128 = arith.subf %118, %127 : vector<16x32xf32>
    %129 = arith.mulf %128, %128 : vector<16x32xf32>
    %cst_58 = arith.constant dense<0.000000e+00> : vector<16xf32>
    %130 = vector.multi_reduction <add>, %129, %cst_58 [1] : vector<16x32xf32> to vector<16xf32>
    %131 = vector.shape_cast %130 : vector<16xf32> to vector<16x1xf32>
    %cst_59 = arith.constant 3.200000e+01 : f32
    %132 = vector.broadcast %cst_59 : f32 to vector<16x1xf32>
    %133 = arith.divf %131, %132 : vector<16x1xf32>
    %134 = vector.broadcast %126 : vector<16x1xf32> to vector<16x32xf32>
    %135 = arith.subf %118, %134 : vector<16x32xf32>
    %cst_60 = arith.constant 9.99999996E-13 : f32
    %136 = vector.broadcast %cst_60 : f32 to vector<16x1xf32>
    %137 = arith.addf %133, %136 : vector<16x1xf32>
    %138 = math.rsqrt %137 : vector<16x1xf32>
    %139 = vector.broadcast %138 : vector<16x1xf32> to vector<16x32xf32>
    %140 = arith.mulf %135, %139 : vector<16x32xf32>
    %141 = vector.broadcast %120 : vector<1x32xf32> to vector<16x32xf32>
    %142 = arith.mulf %140, %141 : vector<16x32xf32>
    %143 = vector.broadcast %122 : vector<1x32xf32> to vector<16x32xf32>
    %144 = arith.addf %142, %143 : vector<16x32xf32>
    %c0_61 = arith.constant 0 : index
    %c0_62 = arith.constant 0 : index
    %c0_63 = arith.constant 0 : index
    %145 = vector.load %arg15[%c0_61, %c0_62, %c0_63] : memref<2x32x64xf32, #tpu.memory_space<vmem>>, vector<1x32x64xf32>
    %146 = vector.shape_cast %145 : vector<1x32x64xf32> to vector<32x64xf32>
    %cst_64 = arith.constant dense<0.000000e+00> : vector<16x64xf32>
    %147 = tpu.matmul %144, %146, %cst_64 {dimension_numbers = #tpu.dot_dimension_numbers<[1], [0], [0], [1], [0, 0, 1, 1], [], []>} : vector<16x32xf32>, vector<32x64xf32>, vector<16x64xf32> -> vector<16x64xf32>
    %c0_65 = arith.constant 0 : index
    %c0_66 = arith.constant 0 : index
    %c0_67 = arith.constant 0 : index
    %148 = vector.load %arg16[%c0_65, %c0_66, %c0_67] : memref<2x1x64xf32, #tpu.memory_space<vmem>>, vector<1x1x64xf32>
    %149 = vector.shape_cast %148 : vector<1x1x64xf32> to vector<1x64xf32>
    %150 = vector.broadcast %149 : vector<1x64xf32> to vector<16x64xf32>
    %151 = arith.addf %147, %150 : vector<16x64xf32>
    %cst_68 = arith.constant 5.000000e-01 : f32
    %152 = vector.broadcast %cst_68 : f32 to vector<16x64xf32>
    %153 = arith.mulf %152, %151 : vector<16x64xf32>
    %cst_69 = arith.constant 4.471500e-02 : f32
    %154 = vector.broadcast %cst_69 : f32 to vector<16x64xf32>
    %155 = arith.mulf %154, %151 : vector<16x64xf32>
    %156 = arith.mulf %155, %151 : vector<16x64xf32>
    %157 = arith.mulf %156, %151 : vector<16x64xf32>
    %158 = arith.addf %151, %157 : vector<16x64xf32>
    %cst_70 = arith.constant 0.797884583 : f32
    %159 = vector.broadcast %cst_70 : f32 to vector<16x64xf32>
    %160 = arith.mulf %159, %158 : vector<16x64xf32>
    %161 = math.tanh %160 : vector<16x64xf32>
    %cst_71 = arith.constant 1.000000e+00 : f32
    %162 = vector.broadcast %cst_71 : f32 to vector<16x64xf32>
    %163 = arith.addf %162, %161 : vector<16x64xf32>
    %164 = arith.mulf %153, %163 : vector<16x64xf32>
    %c0_72 = arith.constant 0 : index
    %c0_73 = arith.constant 0 : index
    %c0_74 = arith.constant 0 : index
    %165 = vector.load %arg17[%c0_72, %c0_73, %c0_74] : memref<2x64x32xf32, #tpu.memory_space<vmem>>, vector<1x64x32xf32>
    %166 = vector.shape_cast %165 : vector<1x64x32xf32> to vector<64x32xf32>
    %cst_75 = arith.constant dense<0.000000e+00> : vector<16x32xf32>
    %167 = tpu.matmul %164, %166, %cst_75 {dimension_numbers = #tpu.dot_dimension_numbers<[1], [0], [0], [1], [0, 0, 1, 1], [], []>} : vector<16x64xf32>, vector<64x32xf32>, vector<16x32xf32> -> vector<16x32xf32>
    %c0_76 = arith.constant 0 : index
    %c0_77 = arith.constant 0 : index
    %c0_78 = arith.constant 0 : index
    %168 = vector.load %arg18[%c0_76, %c0_77, %c0_78] : memref<2x1x32xf32, #tpu.memory_space<vmem>>, vector<1x1x32xf32>
    %169 = vector.shape_cast %168 : vector<1x1x32xf32> to vector<1x32xf32>
    %170 = vector.broadcast %169 : vector<1x32xf32> to vector<16x32xf32>
    %171 = arith.addf %167, %170 : vector<16x32xf32>
    %172 = arith.addf %171, %144 : vector<16x32xf32>
    %c0_79 = arith.constant 0 : index
    %c0_80 = arith.constant 0 : index
    %c0_81 = arith.constant 0 : index
    %173 = vector.load %arg19[%c0_79, %c0_80, %c0_81] : memref<2x1x32xf32, #tpu.memory_space<vmem>>, vector<1x1x32xf32>
    %174 = vector.shape_cast %173 : vector<1x1x32xf32> to vector<1x32xf32>
    %c0_82 = arith.constant 0 : index
    %c0_83 = arith.constant 0 : index
    %c0_84 = arith.constant 0 : index
    %175 = vector.load %arg20[%c0_82, %c0_83, %c0_84] : memref<2x1x32xf32, #tpu.memory_space<vmem>>, vector<1x1x32xf32>
    %176 = vector.shape_cast %175 : vector<1x1x32xf32> to vector<1x32xf32>
    %cst_85 = arith.constant dense<0.000000e+00> : vector<16xf32>
    %177 = vector.multi_reduction <add>, %172, %cst_85 [1] : vector<16x32xf32> to vector<16xf32>
    %178 = vector.shape_cast %177 : vector<16xf32> to vector<16x1xf32>
    %cst_86 = arith.constant 3.200000e+01 : f32
    %179 = vector.broadcast %cst_86 : f32 to vector<16x1xf32>
    %180 = arith.divf %178, %179 : vector<16x1xf32>
    %181 = vector.broadcast %180 : vector<16x1xf32> to vector<16x32xf32>
    %182 = arith.subf %172, %181 : vector<16x32xf32>
    %183 = arith.mulf %182, %182 : vector<16x32xf32>
    %cst_87 = arith.constant dense<0.000000e+00> : vector<16xf32>
    %184 = vector.multi_reduction <add>, %183, %cst_87 [1] : vector<16x32xf32> to vector<16xf32>
    %185 = vector.shape_cast %184 : vector<16xf32> to vector<16x1xf32>
    %cst_88 = arith.constant 3.200000e+01 : f32
    %186 = vector.broadcast %cst_88 : f32 to vector<16x1xf32>
    %187 = arith.divf %185, %186 : vector<16x1xf32>
    %188 = vector.broadcast %180 : vector<16x1xf32> to vector<16x32xf32>
    %189 = arith.subf %172, %188 : vector<16x32xf32>
    %cst_89 = arith.constant 9.99999996E-13 : f32
    %190 = vector.broadcast %cst_89 : f32 to vector<16x1xf32>
    %191 = arith.addf %187, %190 : vector<16x1xf32>
    %192 = math.rsqrt %191 : vector<16x1xf32>
    %193 = vector.broadcast %192 : vector<16x1xf32> to vector<16x32xf32>
    %194 = arith.mulf %189, %193 : vector<16x32xf32>
    %195 = vector.broadcast %174 : vector<1x32xf32> to vector<16x32xf32>
    %196 = arith.mulf %194, %195 : vector<16x32xf32>
    %197 = vector.broadcast %176 : vector<1x32xf32> to vector<16x32xf32>
    %198 = arith.addf %196, %197 : vector<16x32xf32>
    %c1 = arith.constant 1 : index
    %c0_90 = arith.constant 0 : index
    %c0_91 = arith.constant 0 : index
    %199 = vector.load %arg9[%c1, %c0_90, %c0_91] : memref<2x32x96xf32, #tpu.memory_space<vmem>>, vector<1x32x96xf32>
    %200 = vector.shape_cast %199 : vector<1x32x96xf32> to vector<32x96xf32>
    %cst_92 = arith.constant dense<0.000000e+00> : vector<16x96xf32>
    %201 = tpu.matmul %198, %200, %cst_92 {dimension_numbers = #tpu.dot_dimension_numbers<[1], [0], [0], [1], [0, 0, 1, 1], [], []>} : vector<16x32xf32>, vector<32x96xf32>, vector<16x96xf32> -> vector<16x96xf32>
    %c1_93 = arith.constant 1 : index
    %c0_94 = arith.constant 0 : index
    %c0_95 = arith.constant 0 : index
    %202 = vector.load %arg10[%c1_93, %c0_94, %c0_95] : memref<2x1x96xf32, #tpu.memory_space<vmem>>, vector<1x1x96xf32>
    %203 = vector.shape_cast %202 : vector<1x1x96xf32> to vector<1x96xf32>
    %204 = vector.broadcast %203 : vector<1x96xf32> to vector<16x96xf32>
    %205 = arith.addf %201, %204 : vector<16x96xf32>
    %206 = vector.extract_strided_slice %205 {offsets = [0, 0], sizes = [16, 16], strides = [1, 1]} : vector<16x96xf32> to vector<16x16xf32>
    %207 = vector.shape_cast %206 : vector<16x16xf32> to vector<2x8x16xf32>
    %208 = vector.extract_strided_slice %205 {offsets = [0, 32], sizes = [16, 16], strides = [1, 1]} : vector<16x96xf32> to vector<16x16xf32>
    %209 = vector.shape_cast %208 : vector<16x16xf32> to vector<2x8x16xf32>
    %210 = vector.extract_strided_slice %205 {offsets = [0, 64], sizes = [16, 16], strides = [1, 1]} : vector<16x96xf32> to vector<16x16xf32>
    %211 = vector.shape_cast %210 : vector<16x16xf32> to vector<2x8x16xf32>
    "tpu.trace_start"() <{level = 10 : i32, message = "bqd,bkd->bqk"}> : () -> ()
    %cst_96 = arith.constant dense<0.000000e+00> : vector<2x8x8xf32>
    %212 = tpu.matmul %207, %209, %cst_96 {dimension_numbers = #tpu.dot_dimension_numbers<[2], [2], [1], [1], [0, 0, 0, 1, 1, 1], [0], [0]>} : vector<2x8x16xf32>, vector<2x8x16xf32>, vector<2x8x8xf32> -> vector<2x8x8xf32>
    "tpu.trace_stop"() : () -> ()
    %cst_97 = arith.constant 2.500000e-01 : f32
    %213 = vector.broadcast %cst_97 : f32 to vector<2x8x8xf32>
    %214 = arith.mulf %212, %213 : vector<2x8x8xf32>
    %215 = vector.shape_cast %10 : vector<2x8xf32> to vector<2x1x8xf32>
    %216 = vector.broadcast %215 : vector<2x1x8xf32> to vector<2x8x8xf32>
    %217 = arith.addf %214, %216 : vector<2x8x8xf32>
    %cst_98 = arith.constant dense<0xFF800000> : vector<2x8xf32>
    %218 = vector.multi_reduction <maximumf>, %217, %cst_98 [2] : vector<2x8x8xf32> to vector<2x8xf32>
    %219 = vector.shape_cast %218 : vector<2x8xf32> to vector<2x8x1xf32>
    %220 = vector.broadcast %219 : vector<2x8x1xf32> to vector<2x8x8xf32>
    %221 = arith.subf %217, %220 : vector<2x8x8xf32>
    %222 = math.exp %221 : vector<2x8x8xf32>
    %cst_99 = arith.constant dense<0.000000e+00> : vector<2x8xf32>
    %223 = vector.multi_reduction <add>, %222, %cst_99 [2] : vector<2x8x8xf32> to vector<2x8xf32>
    %224 = vector.shape_cast %223 : vector<2x8xf32> to vector<2x8x1xf32>
    %225 = vector.broadcast %224 : vector<2x8x1xf32> to vector<2x8x8xf32>
    %226 = arith.divf %222, %225 : vector<2x8x8xf32>
    "tpu.trace_start"() <{level = 10 : i32, message = "bqk,bkd->bqd"}> : () -> ()
    %cst_100 = arith.constant dense<0.000000e+00> : vector<2x8x16xf32>
    %227 = tpu.matmul %226, %211, %cst_100 {dimension_numbers = #tpu.dot_dimension_numbers<[2], [1], [1], [2], [0, 0, 0, 1, 1, 2], [0], [0]>} : vector<2x8x8xf32>, vector<2x8x16xf32>, vector<2x8x16xf32> -> vector<2x8x16xf32>
    "tpu.trace_stop"() : () -> ()
    %228 = vector.shape_cast %227 : vector<2x8x16xf32> to vector<16x16xf32>
    %229 = vector.extract_strided_slice %205 {offsets = [0, 16], sizes = [16, 16], strides = [1, 1]} : vector<16x96xf32> to vector<16x16xf32>
    %230 = vector.shape_cast %229 : vector<16x16xf32> to vector<2x8x16xf32>
    %231 = vector.extract_strided_slice %205 {offsets = [0, 48], sizes = [16, 16], strides = [1, 1]} : vector<16x96xf32> to vector<16x16xf32>
    %232 = vector.shape_cast %231 : vector<16x16xf32> to vector<2x8x16xf32>
    %233 = vector.extract_strided_slice %205 {offsets = [0, 80], sizes = [16, 16], strides = [1, 1]} : vector<16x96xf32> to vector<16x16xf32>
    %234 = vector.shape_cast %233 : vector<16x16xf32> to vector<2x8x16xf32>
    "tpu.trace_start"() <{level = 10 : i32, message = "bqd,bkd->bqk"}> : () -> ()
    %cst_101 = arith.constant dense<0.000000e+00> : vector<2x8x8xf32>
    %235 = tpu.matmul %230, %232, %cst_101 {dimension_numbers = #tpu.dot_dimension_numbers<[2], [2], [1], [1], [0, 0, 0, 1, 1, 1], [0], [0]>} : vector<2x8x16xf32>, vector<2x8x16xf32>, vector<2x8x8xf32> -> vector<2x8x8xf32>
    "tpu.trace_stop"() : () -> ()
    %cst_102 = arith.constant 2.500000e-01 : f32
    %236 = vector.broadcast %cst_102 : f32 to vector<2x8x8xf32>
    %237 = arith.mulf %235, %236 : vector<2x8x8xf32>
    %238 = vector.shape_cast %10 : vector<2x8xf32> to vector<2x1x8xf32>
    %239 = vector.broadcast %238 : vector<2x1x8xf32> to vector<2x8x8xf32>
    %240 = arith.addf %237, %239 : vector<2x8x8xf32>
    %cst_103 = arith.constant dense<0xFF800000> : vector<2x8xf32>
    %241 = vector.multi_reduction <maximumf>, %240, %cst_103 [2] : vector<2x8x8xf32> to vector<2x8xf32>
    %242 = vector.shape_cast %241 : vector<2x8xf32> to vector<2x8x1xf32>
    %243 = vector.broadcast %242 : vector<2x8x1xf32> to vector<2x8x8xf32>
    %244 = arith.subf %240, %243 : vector<2x8x8xf32>
    %245 = math.exp %244 : vector<2x8x8xf32>
    %cst_104 = arith.constant dense<0.000000e+00> : vector<2x8xf32>
    %246 = vector.multi_reduction <add>, %245, %cst_104 [2] : vector<2x8x8xf32> to vector<2x8xf32>
    %247 = vector.shape_cast %246 : vector<2x8xf32> to vector<2x8x1xf32>
    %248 = vector.broadcast %247 : vector<2x8x1xf32> to vector<2x8x8xf32>
    %249 = arith.divf %245, %248 : vector<2x8x8xf32>
    "tpu.trace_start"() <{level = 10 : i32, message = "bqk,bkd->bqd"}> : () -> ()
    %cst_105 = arith.constant dense<0.000000e+00> : vector<2x8x16xf32>
    %250 = tpu.matmul %249, %234, %cst_105 {dimension_numbers = #tpu.dot_dimension_numbers<[2], [1], [1], [2], [0, 0, 0, 1, 1, 2], [0], [0]>} : vector<2x8x8xf32>, vector<2x8x16xf32>, vector<2x8x16xf32> -> vector<2x8x16xf32>
    "tpu.trace_stop"() : () -> ()
    %251 = vector.shape_cast %250 : vector<2x8x16xf32> to vector<16x16xf32>
    %252 = tpu.concatenate %228, %251 in 1 : vector<16x16xf32>, vector<16x16xf32> -> vector<16x32xf32>
    %c1_106 = arith.constant 1 : index
    %c0_107 = arith.constant 0 : index
    %c0_108 = arith.constant 0 : index
    %253 = vector.load %arg11[%c1_106, %c0_107, %c0_108] : memref<2x32x32xf32, #tpu.memory_space<vmem>>, vector<1x32x32xf32>
    %254 = vector.shape_cast %253 : vector<1x32x32xf32> to vector<32x32xf32>
    %cst_109 = arith.constant dense<0.000000e+00> : vector<16x32xf32>
    %255 = tpu.matmul %252, %254, %cst_109 {dimension_numbers = #tpu.dot_dimension_numbers<[1], [0], [0], [1], [0, 0, 1, 1], [], []>} : vector<16x32xf32>, vector<32x32xf32>, vector<16x32xf32> -> vector<16x32xf32>
    %c1_110 = arith.constant 1 : index
    %c0_111 = arith.constant 0 : index
    %c0_112 = arith.constant 0 : index
    %256 = vector.load %arg12[%c1_110, %c0_111, %c0_112] : memref<2x1x32xf32, #tpu.memory_space<vmem>>, vector<1x1x32xf32>
    %257 = vector.shape_cast %256 : vector<1x1x32xf32> to vector<1x32xf32>
    %258 = vector.broadcast %257 : vector<1x32xf32> to vector<16x32xf32>
    %259 = arith.addf %255, %258 : vector<16x32xf32>
    %260 = arith.addf %259, %198 : vector<16x32xf32>
    %c1_113 = arith.constant 1 : index
    %c0_114 = arith.constant 0 : index
    %c0_115 = arith.constant 0 : index
    %261 = vector.load %arg13[%c1_113, %c0_114, %c0_115] : memref<2x1x32xf32, #tpu.memory_space<vmem>>, vector<1x1x32xf32>
    %262 = vector.shape_cast %261 : vector<1x1x32xf32> to vector<1x32xf32>
    %c1_116 = arith.constant 1 : index
    %c0_117 = arith.constant 0 : index
    %c0_118 = arith.constant 0 : index
    %263 = vector.load %arg14[%c1_116, %c0_117, %c0_118] : memref<2x1x32xf32, #tpu.memory_space<vmem>>, vector<1x1x32xf32>
    %264 = vector.shape_cast %263 : vector<1x1x32xf32> to vector<1x32xf32>
    %cst_119 = arith.constant dense<0.000000e+00> : vector<16xf32>
    %265 = vector.multi_reduction <add>, %260, %cst_119 [1] : vector<16x32xf32> to vector<16xf32>
    %266 = vector.shape_cast %265 : vector<16xf32> to vector<16x1xf32>
    %cst_120 = arith.constant 3.200000e+01 : f32
    %267 = vector.broadcast %cst_120 : f32 to vector<16x1xf32>
    %268 = arith.divf %266, %267 : vector<16x1xf32>
    %269 = vector.broadcast %268 : vector<16x1xf32> to vector<16x32xf32>
    %270 = arith.subf %260, %269 : vector<16x32xf32>
    %271 = arith.mulf %270, %270 : vector<16x32xf32>
    %cst_121 = arith.constant dense<0.000000e+00> : vector<16xf32>
    %272 = vector.multi_reduction <add>, %271, %cst_121 [1] : vector<16x32xf32> to vector<16xf32>
    %273 = vector.shape_cast %272 : vector<16xf32> to vector<16x1xf32>
    %cst_122 = arith.constant 3.200000e+01 : f32
    %274 = vector.broadcast %cst_122 : f32 to vector<16x1xf32>
    %275 = arith.divf %273, %274 : vector<16x1xf32>
    %276 = vector.broadcast %268 : vector<16x1xf32> to vector<16x32xf32>
    %277 = arith.subf %260, %276 : vector<16x32xf32>
    %cst_123 = arith.constant 9.99999996E-13 : f32
    %278 = vector.broadcast %cst_123 : f32 to vector<16x1xf32>
    %279 = arith.addf %275, %278 : vector<16x1xf32>
    %280 = math.rsqrt %279 : vector<16x1xf32>
    %281 = vector.broadcast %280 : vector<16x1xf32> to vector<16x32xf32>
    %282 = arith.mulf %277, %281 : vector<16x32xf32>
    %283 = vector.broadcast %262 : vector<1x32xf32> to vector<16x32xf32>
    %284 = arith.mulf %282, %283 : vector<16x32xf32>
    %285 = vector.broadcast %264 : vector<1x32xf32> to vector<16x32xf32>
    %286 = arith.addf %284, %285 : vector<16x32xf32>
    %c1_124 = arith.constant 1 : index
    %c0_125 = arith.constant 0 : index
    %c0_126 = arith.constant 0 : index
    %287 = vector.load %arg15[%c1_124, %c0_125, %c0_126] : memref<2x32x64xf32, #tpu.memory_space<vmem>>, vector<1x32x64xf32>
    %288 = vector.shape_cast %287 : vector<1x32x64xf32> to vector<32x64xf32>
    %cst_127 = arith.constant dense<0.000000e+00> : vector<16x64xf32>
    %289 = tpu.matmul %286, %288, %cst_127 {dimension_numbers = #tpu.dot_dimension_numbers<[1], [0], [0], [1], [0, 0, 1, 1], [], []>} : vector<16x32xf32>, vector<32x64xf32>, vector<16x64xf32> -> vector<16x64xf32>
    %c1_128 = arith.constant 1 : index
    %c0_129 = arith.constant 0 : index
    %c0_130 = arith.constant 0 : index
    %290 = vector.load %arg16[%c1_128, %c0_129, %c0_130] : memref<2x1x64xf32, #tpu.memory_space<vmem>>, vector<1x1x64xf32>
    %291 = vector.shape_cast %290 : vector<1x1x64xf32> to vector<1x64xf32>
    %292 = vector.broadcast %291 : vector<1x64xf32> to vector<16x64xf32>
    %293 = arith.addf %289, %292 : vector<16x64xf32>
    %cst_131 = arith.constant 5.000000e-01 : f32
    %294 = vector.broadcast %cst_131 : f32 to vector<16x64xf32>
    %295 = arith.mulf %294, %293 : vector<16x64xf32>
    %cst_132 = arith.constant 4.471500e-02 : f32
    %296 = vector.broadcast %cst_132 : f32 to vector<16x64xf32>
    %297 = arith.mulf %296, %293 : vector<16x64xf32>
    %298 = arith.mulf %297, %293 : vector<16x64xf32>
    %299 = arith.mulf %298, %293 : vector<16x64xf32>
    %300 = arith.addf %293, %299 : vector<16x64xf32>
    %cst_133 = arith.constant 0.797884583 : f32
    %301 = vector.broadcast %cst_133 : f32 to vector<16x64xf32>
    %302 = arith.mulf %301, %300 : vector<16x64xf32>
    %303 = math.tanh %302 : vector<16x64xf32>
    %cst_134 = arith.constant 1.000000e+00 : f32
    %304 = vector.broadcast %cst_134 : f32 to vector<16x64xf32>
    %305 = arith.addf %304, %303 : vector<16x64xf32>
    %306 = arith.mulf %295, %305 : vector<16x64xf32>
    %c1_135 = arith.constant 1 : index
    %c0_136 = arith.constant 0 : index
    %c0_137 = arith.constant 0 : index
    %307 = vector.load %arg17[%c1_135, %c0_136, %c0_137] : memref<2x64x32xf32, #tpu.memory_space<vmem>>, vector<1x64x32xf32>
    %308 = vector.shape_cast %307 : vector<1x64x32xf32> to vector<64x32xf32>
    %cst_138 = arith.constant dense<0.000000e+00> : vector<16x32xf32>
    %309 = tpu.matmul %306, %308, %cst_138 {dimension_numbers = #tpu.dot_dimension_numbers<[1], [0], [0], [1], [0, 0, 1, 1], [], []>} : vector<16x64xf32>, vector<64x32xf32>, vector<16x32xf32> -> vector<16x32xf32>
    %c1_139 = arith.constant 1 : index
    %c0_140 = arith.constant 0 : index
    %c0_141 = arith.constant 0 : index
    %310 = vector.load %arg18[%c1_139, %c0_140, %c0_141] : memref<2x1x32xf32, #tpu.memory_space<vmem>>, vector<1x1x32xf32>
    %311 = vector.shape_cast %310 : vector<1x1x32xf32> to vector<1x32xf32>
    %312 = vector.broadcast %311 : vector<1x32xf32> to vector<16x32xf32>
    %313 = arith.addf %309, %312 : vector<16x32xf32>
    %314 = arith.addf %313, %286 : vector<16x32xf32>
    %c1_142 = arith.constant 1 : index
    %c0_143 = arith.constant 0 : index
    %c0_144 = arith.constant 0 : index
    %315 = vector.load %arg19[%c1_142, %c0_143, %c0_144] : memref<2x1x32xf32, #tpu.memory_space<vmem>>, vector<1x1x32xf32>
    %316 = vector.shape_cast %315 : vector<1x1x32xf32> to vector<1x32xf32>
    %c1_145 = arith.constant 1 : index
    %c0_146 = arith.constant 0 : index
    %c0_147 = arith.constant 0 : index
    %317 = vector.load %arg20[%c1_145, %c0_146, %c0_147] : memref<2x1x32xf32, #tpu.memory_space<vmem>>, vector<1x1x32xf32>
    %318 = vector.shape_cast %317 : vector<1x1x32xf32> to vector<1x32xf32>
    %cst_148 = arith.constant dense<0.000000e+00> : vector<16xf32>
    %319 = vector.multi_reduction <add>, %314, %cst_148 [1] : vector<16x32xf32> to vector<16xf32>
    %320 = vector.shape_cast %319 : vector<16xf32> to vector<16x1xf32>
    %cst_149 = arith.constant 3.200000e+01 : f32
    %321 = vector.broadcast %cst_149 : f32 to vector<16x1xf32>
    %322 = arith.divf %320, %321 : vector<16x1xf32>
    %323 = vector.broadcast %322 : vector<16x1xf32> to vector<16x32xf32>
    %324 = arith.subf %314, %323 : vector<16x32xf32>
    %325 = arith.mulf %324, %324 : vector<16x32xf32>
    %cst_150 = arith.constant dense<0.000000e+00> : vector<16xf32>
    %326 = vector.multi_reduction <add>, %325, %cst_150 [1] : vector<16x32xf32> to vector<16xf32>
    %327 = vector.shape_cast %326 : vector<16xf32> to vector<16x1xf32>
    %cst_151 = arith.constant 3.200000e+01 : f32
    %328 = vector.broadcast %cst_151 : f32 to vector<16x1xf32>
    %329 = arith.divf %327, %328 : vector<16x1xf32>
    %330 = vector.broadcast %322 : vector<16x1xf32> to vector<16x32xf32>
    %331 = arith.subf %314, %330 : vector<16x32xf32>
    %cst_152 = arith.constant 9.99999996E-13 : f32
    %332 = vector.broadcast %cst_152 : f32 to vector<16x1xf32>
    %333 = arith.addf %329, %332 : vector<16x1xf32>
    %334 = math.rsqrt %333 : vector<16x1xf32>
    %335 = vector.broadcast %334 : vector<16x1xf32> to vector<16x32xf32>
    %336 = arith.mulf %331, %335 : vector<16x32xf32>
    %337 = vector.broadcast %316 : vector<1x32xf32> to vector<16x32xf32>
    %338 = arith.mulf %336, %337 : vector<16x32xf32>
    %339 = vector.broadcast %318 : vector<1x32xf32> to vector<16x32xf32>
    %340 = arith.addf %338, %339 : vector<16x32xf32>
    %341 = arith.addf %56, %340 : vector<16x32xf32>
    %342 = vector.shape_cast %341 : vector<16x32xf32> to vector<2x8x32xf32>
    %343 = vector.shape_cast %6 : vector<2x8xf32> to vector<2x8x1xf32>
    %344 = vector.broadcast %343 : vector<2x8x1xf32> to vector<2x8x32xf32>
    %345 = arith.mulf %342, %344 : vector<2x8x32xf32>
    %cst_153 = arith.constant dense<0.000000e+00> : vector<2x32xf32>
    %346 = vector.multi_reduction <add>, %345, %cst_153 [1] : vector<2x8x32xf32> to vector<2x32xf32>
    %cst_154 = arith.constant dense<0.000000e+00> : vector<2xf32>
    %347 = vector.multi_reduction <add>, %6, %cst_154 [1] : vector<2x8xf32> to vector<2xf32>
    %348 = vector.shape_cast %347 : vector<2xf32> to vector<2x1xf32>
    %cst_155 = arith.constant 9.99999971E-10 : f32
    %349 = vector.broadcast %cst_155 : f32 to vector<2x1xf32>
    %350 = arith.maximumf %348, %349 : vector<2x1xf32>
    %351 = vector.broadcast %350 : vector<2x1xf32> to vector<2x32xf32>
    %352 = arith.divf %346, %351 : vector<2x32xf32>
    %c0_156 = arith.constant 0 : index
    %c0_157 = arith.constant 0 : index
    %c0_158 = arith.constant 0 : index
    %353 = vector.load %arg21[%c0_156, %c0_157, %c0_158] : memref<1x2x32xf32, #tpu.memory_space<vmem>>, vector<1x2x32xf32>
    %354 = vector.shape_cast %353 : vector<1x2x32xf32> to vector<2x32xf32>
    %355 = vector.shape_cast %352 : vector<2x32xf32> to vector<1x2x32xf32>
    tpu.vector_store %arg21[%c0_156, %c0_157, %c0_158], %355 {strides = array<i32>} : memref<1x2x32xf32, #tpu.memory_space<vmem>>, vector<1x2x32xf32>,
    return
  }
  func.func @transform_0(%arg0: i32) -> (i32, i32, i32) {
    %c0_i32 = arith.constant 0 : i32
    %c0_i32_0 = arith.constant 0 : i32
    %c0_i32_1 = arith.constant 0 : i32
    return %arg0, %c0_i32, %c0_i32_0 : i32, i32, i32
  }
  func.func @transform_1(%arg0: i32) -> (i32, i32, i32) {
    %c0_i32 = arith.constant 0 : i32
    %c0_i32_0 = arith.constant 0 : i32
    %c0_i32_1 = arith.constant 0 : i32
    return %arg0, %c0_i32, %c0_i32_0 : i32, i32, i32
  }
  func.func @transform_2(%arg0: i32) -> (i32, i32, i32) {
    %c0_i32 = arith.constant 0 : i32
    %c0_i32_0 = arith.constant 0 : i32
    %c0_i32_1 = arith.constant 0 : i32
    return %arg0, %c0_i32, %c0_i32_0 : i32, i32, i32
  }
  func.func @transform_3(%arg0: i32) -> (i32, i32) {
    %c0_i32 = arith.constant 0 : i32
    %c0_i32_0 = arith.constant 0 : i32
    %c0_i32_1 = arith.constant 0 : i32
    return %c0_i32, %c0_i32_0 : i32, i32
  }
  func.func @transform_4(%arg0: i32) -> (i32, i32) {
    %c0_i32 = arith.constant 0 : i32
    %c0_i32_0 = arith.constant 0 : i32
    %c0_i32_1 = arith.constant 0 : i32
    return %c0_i32, %c0_i32_0 : i32, i32
  }
  func.func @transform_5(%arg0: i32) -> (i32, i32) {
    %c0_i32 = arith.constant 0 : i32
    %c0_i32_0 = arith.constant 0 : i32
    %c0_i32_1 = arith.constant 0 : i32
    return %c0_i32, %c0_i32_0 : i32, i32
  }
  func.func @transform_6(%arg0: i32) -> (i32, i32) {
    %c0_i32 = arith.constant 0 : i32
    %c0_i32_0 = arith.constant 0 : i32
    %c0_i32_1 = arith.constant 0 : i32
    return %c0_i32, %c0_i32_0 : i32, i32
  }
  func.func @transform_7(%arg0: i32) -> (i32, i32) {
    %c0_i32 = arith.constant 0 : i32
    %c0_i32_0 = arith.constant 0 : i32
    %c0_i32_1 = arith.constant 0 : i32
    return %c0_i32, %c0_i32_0 : i32, i32
  }
  func.func @transform_8(%arg0: i32) -> (i32, i32, i32) {
    %c0_i32 = arith.constant 0 : i32
    %c0_i32_0 = arith.constant 0 : i32
    %c0_i32_1 = arith.constant 0 : i32
    %c0_i32_2 = arith.constant 0 : i32
    return %c0_i32, %c0_i32_0, %c0_i32_1 : i32, i32, i32
  }
  func.func @transform_9(%arg0: i32) -> (i32, i32, i32) {
    %c0_i32 = arith.constant 0 : i32
    %c0_i32_0 = arith.constant 0 : i32
    %c0_i32_1 = arith.constant 0 : i32
    %c0_i32_2 = arith.constant 0 : i32
    return %c0_i32, %c0_i32_0, %c0_i32_1 : i32, i32, i32
  }
  func.func @transform_10(%arg0: i32) -> (i32, i32, i32) {
    %c0_i32 = arith.constant 0 : i32
    %c0_i32_0 = arith.constant 0 : i32
    %c0_i32_1 = arith.constant 0 : i32
    %c0_i32_2 = arith.constant 0 : i32
    return %c0_i32, %c0_i32_0, %c0_i32_1 : i32, i32, i32
  }
  func.func @transform_11(%arg0: i32) -> (i32, i32, i32) {
    %c0_i32 = arith.constant 0 : i32
    %c0_i32_0 = arith.constant 0 : i32
    %c0_i32_1 = arith.constant 0 : i32
    %c0_i32_2 = arith.constant 0 : i32
    return %c0_i32, %c0_i32_0, %c0_i32_1 : i32, i32, i32
  }
  func.func @transform_12(%arg0: i32) -> (i32, i32, i32) {
    %c0_i32 = arith.constant 0 : i32
    %c0_i32_0 = arith.constant 0 : i32
    %c0_i32_1 = arith.constant 0 : i32
    %c0_i32_2 = arith.constant 0 : i32
    return %c0_i32, %c0_i32_0, %c0_i32_1 : i32, i32, i32
  }
  func.func @transform_13(%arg0: i32) -> (i32, i32, i32) {
    %c0_i32 = arith.constant 0 : i32
    %c0_i32_0 = arith.constant 0 : i32
    %c0_i32_1 = arith.constant 0 : i32
    %c0_i32_2 = arith.constant 0 : i32
    return %c0_i32, %c0_i32_0, %c0_i32_1 : i32, i32, i32
  }
  func.func @transform_14(%arg0: i32) -> (i32, i32, i32) {
    %c0_i32 = arith.constant 0 : i32
    %c0_i32_0 = arith.constant 0 : i32
    %c0_i32_1 = arith.constant 0 : i32
    %c0_i32_2 = arith.constant 0 : i32
    return %c0_i32, %c0_i32_0, %c0_i32_1 : i32, i32, i32
  }
  func.func @transform_15(%arg0: i32) -> (i32, i32, i32) {
    %c0_i32 = arith.constant 0 : i32
    %c0_i32_0 = arith.constant 0 : i32
    %c0_i32_1 = arith.constant 0 : i32
    %c0_i32_2 = arith.constant 0 : i32
    return %c0_i32, %c0_i32_0, %c0_i32_1 : i32, i32, i32
  }
  func.func @transform_16(%arg0: i32) -> (i32, i32, i32) {
    %c0_i32 = arith.constant 0 : i32
    %c0_i32_0 = arith.constant 0 : i32
    %c0_i32_1 = arith.constant 0 : i32
    %c0_i32_2 = arith.constant 0 : i32
    return %c0_i32, %c0_i32_0, %c0_i32_1 : i32, i32, i32
  }
  func.func @transform_17(%arg0: i32) -> (i32, i32, i32) {
    %c0_i32 = arith.constant 0 : i32
    %c0_i32_0 = arith.constant 0 : i32
    %c0_i32_1 = arith.constant 0 : i32
    %c0_i32_2 = arith.constant 0 : i32
    return %c0_i32, %c0_i32_0, %c0_i32_1 : i32, i32, i32
  }
  func.func @transform_18(%arg0: i32) -> (i32, i32, i32) {
    %c0_i32 = arith.constant 0 : i32
    %c0_i32_0 = arith.constant 0 : i32
    %c0_i32_1 = arith.constant 0 : i32
    %c0_i32_2 = arith.constant 0 : i32
    return %c0_i32, %c0_i32_0, %c0_i32_1 : i32, i32, i32
  }
  func.func @transform_19(%arg0: i32) -> (i32, i32, i32) {
    %c0_i32 = arith.constant 0 : i32
    %c0_i32_0 = arith.constant 0 : i32
    %c0_i32_1 = arith.constant 0 : i32
    %c0_i32_2 = arith.constant 0 : i32
    return %c0_i32, %c0_i32_0, %c0_i32_1 : i32, i32, i32
  }
  func.func @transform_20(%arg0: i32) -> (i32, i32, i32) {
    %c0_i32 = arith.constant 0 : i32
    %c0_i32_0 = arith.constant 0 : i32
    %c0_i32_1 = arith.constant 0 : i32
    return %arg0, %c0_i32, %c0_i32_0 : i32, i32, i32
  }
}

</mosaic_0001>

<bundles_post_ra>
// kernel: tower_encoder_forward.3
= control target key start
LH: loop header
LB: loop body
LE: loop exit
PB: predicated region body
PF: predicated region fallthrough
CT: control target
= control target key end

     0   :  { %s121_s16 = smov 32   ;;  %s192_s0 = inlined_call_operand.vmem [shape: f32[2,2,32], index: 0, kind: input, shape index: {}]   ;;  %s193_s1 = inlined_call_operand.vmem [shape: f32[96,128], index: 1, kind: input, shape index: {}]   ;;  %s194_s2 = inlined_call_operand.vmem [shape: f32[1,128], index: 2, kind: input, shape index: {}]   ;;  %s195_s3 = inlined_call_operand.hbm [shape: f32[2,128], index: 3, kind: output, shape index: {}]  }
   0x1   :  { %v89_v0 = vld [vmem:[%s192_s0 + $0x2] sm:$0x3]  ;;  %v15_v1 = vld [vmem:[%s192_s0] sm:$0x3]  ;;  %v43_v3 = vld [vmem:[%s193_s1 + $0x58] sm:$0xff] }
   0x2   :  { %21 = vrot.lane.b32.xlu0 %v89_v0, %s121_s16  ;;  %v18_v2 = vsub.f32 %v15_v1, %v89_v0  ;;  %v42_v4 = vld [vmem:[%s193_s1 + $0x50] sm:$0xff]  ;;  %56 = vmatpush.msra.mxu0 %v43_v3  ;;  %v41_v5 = vld [vmem:[%s193_s1 + $0x48] sm:$0xff] }
   0x4   :  { %57 = vmatpush.msra.mxu0 %v42_v4 }
   0x5   :  { %8 = vsyncpa [#allocation3], 0  ;;  %v19_v6 = vand.u32 2147483647, %v18_v2  ;;  %v40_v7 = vld [vmem:[%s193_s1 + $0x40] sm:$0xff]  ;;  %v39_v8 = vld [vmem:[%s193_s1 + $0x38] sm:$0xff] }
   0x6   :  { %58 = vmatpush.msra.mxu0 %v41_v5  ;;  %s122_s26 = smov 64   ;;  %v38_v9 = vld [vmem:[%s193_s1 + $0x30] sm:$0xff]  ;;  %v37_v10 = vld [vmem:[%s193_s1 + $0x28] sm:$0xff]  ;;  %v36_v11 = vld [vmem:[%s193_s1 + $0x20] sm:$0xff]  ;;  %vm28_vm0 = vcmask 261120   ;;  %vm30_vm1 = vcmask 523264  }
   0x7   :  { %v35_v12 = vld [vmem:[%s193_s1 + $0x18] sm:$0xff]  ;;  %v34_v13 = vld [vmem:[%s193_s1 + $0x10] sm:$0xff]  ;;  %v33_v14 = vld [vmem:[%s193_s1 + $0x8] sm:$0xff]  ;;  %vm48_vm2 = vcmask 785408   ;;  %s123_s16 = smov [#allocation2]   ;;  %s80_s20 = sshll.u32 %s195_s3, 4  ;;  %s81_s20 = int_to_ptr.hbm [resolvable:$true] %s80_s20 }
   0x8   :  { %59 = vmatpush.msra.mxu0 %v40_v7  ;;  %v32_v15 = vld [vmem:[%s193_s1] sm:$0xff]  ;;  %s78_s17 = sshll.u32 %s123_s16, 4  ;;  %s79_s17 = int_to_ptr.vmem [resolvable:$true] %s78_s17 }
   0x9   :  { %v94_v20 = vld [vmem:[%s194_s2] ss:$0 sm:$0xff] }
   0xa   :  { %25 = vrot.lane.b32.xlu0 %v19_v6, %s122_s26  ;;  %60 = vmatpush.msra.mxu0 %v39_v8 }
   0xc   :  { %61 = vmatpush.msra.mxu0 %v38_v9 }
   0xe   :  { %62 = vmatpush.msra.mxu0 %v37_v10 }
  0x10   :  { %63 = vmatpush.msra.mxu0 %v36_v11 }
  0x12   :  { %64 = vmatpush.msra.mxu0 %v35_v12 }
  0x14   :  { %65 = vmatpush.msra.mxu0 %v34_v13 }
  0x16   :  { %66 = vmatpush.msra.mxu0 %v33_v14 }
  0x18   :  { %67 = vmatpush.msra.mxu0 %v32_v15 }
  0x74   :  { %v22_v16 = vpop.permute.xlu0 %21 }
  0x75   :  { %v29_v17 = vsel %vm28_vm0, %v15_v1, %v22_v16 }
  0x7c   :  { %v26_v18 = vpop.permute.xlu0 %25 }
  0x7d   :  { %v31_v19 = vsel %vm30_vm1, %v29_v17, %v26_v18 }
  0x7e   :  { %90 = vmatmul.msk.f32.vlgmr.msra.gmra.mxu0 %vm48_vm2, %v31_v19 }
  0xfb   :  { %v69_v21 = vpop.f32.mrf.mxu0 }
  0xfc   :  { %v70_v22 = vadd.f32 %v94_v20, %v69_v21 }
  0xfe   :  { %72 = vst [vmem:[#allocation2] sm:$0x3] %v70_v22 }
  0xff   :  { %83 = dma.vmem_to_hbm [thread:$0]  %s79_s17, 32, %s81_s20, [#allocation3]  }
 0x100   :  { %119 = dma.done.wait [#allocation3], 32  }
 0x101   :  { %120 = vsyncadd [#allocation3], 4294967264 }
 0x102   :  { %88 = vsyncpa [#allocation3], 1 }

// kernel: tower_encoder_forward.2
= control target key start
LH: loop header
LB: loop body
LE: loop exit
PB: predicated region body
PF: predicated region fallthrough
CT: control target
= control target key end

     0   :  { %s3051_s0 = inlined_call_operand.vmem [shape: s32[2,16,1], index: 0, kind: input, shape index: {}]   ;;  %s3052_s1 = inlined_call_operand.vmem [shape: s32[2,16,1], index: 1, kind: input, shape index: {}]   ;;  %s3053_s2 = inlined_call_operand.vmem [shape: s32[2,2,8], index: 2, kind: input, shape index: {}]   ;;  %s3054_s3 = inlined_call_operand.vmem [shape: f32[100,32], index: 3, kind: input, shape index: {}]   ;;  %s3055_s4 = inlined_call_operand.vmem [shape: f32[16,32], index: 4, kind: input, shape index: {}]   ;;  %s3056_s5 = inlined_call_operand.vmem [shape: f32[2,32], index: 5, kind: input, shape index: {}]   ;;  %s3057_s6 = inlined_call_operand.vmem [shape: f32[1,32], index: 6, kind: input, shape index: {}]   ;;  %s3058_s7 = inlined_call_operand.vmem [shape: f32[1,32], index: 7, kind: input, shape index: {}]   ;;  %s3059_s8 = inlined_call_operand.vmem [shape: f32[2,32,96], index: 8, kind: input, shape index: {}]   ;;  %s3060_s9 = inlined_call_operand.vmem [shape: f32[2,1,96], index: 9, kind: input, shape index: {}]   ;;  %s3061_s10 = inlined_call_operand.vmem [shape: f32[2,32,32], index: 10, kind: input, shape index: {}]   ;;  %s3062_s11 = inlined_call_operand.vmem [shape: f32[2,1,32], index: 11, kind: input, shape index: {}]   ;;  %s3063_s12 = inlined_call_operand.vmem [shape: f32[2,1,32], index: 12, kind: input, shape index: {}]   ;;  %s3064_s13 = inlined_call_operand.vmem [shape: f32[2,1,32], index: 13, kind: input, shape index: {}]   ;;  %s3065_s14 = inlined_call_operand.vmem [shape: f32[2,32,64], index: 14, kind: input, shape index: {}]   ;;  %s3066_s15 = inlined_call_operand.vmem [shape: f32[2,1,64], index: 15, kind: input, shape index: {}]   ;;  %s3067_s16 = inlined_call_operand.vmem [shape: f32[2,64,32], index: 16, kind: input, shape index: {}]   ;;  %s3068_s17 = inlined_call_operand.vmem [shape: f32[2,1,32], index: 17, kind: input, shape index: {}]   ;;  %s3069_s18 = inlined_call_operand.vmem [shape: f32[2,1,32], index: 18, kind: input, shape index: {}]   ;;  %s3070_s19 = inlined_call_operand.vmem [shape: f32[2,1,32], index: 19, kind: input, shape index: {}]   ;;  %s3071_s20 = inlined_call_operand.vmem [shape: f32[2,2,32], index: 20, kind: output, shape index: {}]  }
   0x1   :  { %3081 = sst [smem:[#allocation3_spill]] %s3051_s0 }
   0x2   :  { %3082 = sst [smem:[#allocation4_spill]] %s3052_s1  ;;  %s2578_s1 = smov 0  }
   0x3   :  { %3083 = sst [smem:[#allocation5_spill]] %s3053_s2 }
   0x4   :  { %3084 = sst [smem:[#allocation6_spill]] %s3054_s3 }
   0x5   :  { %3085 = sst [smem:[#allocation7_spill]] %s3055_s4 }
   0x6 LB: > { %3086 = sst [smem:[#allocation2_spill]] %s2462_s1  ;;  %s2253_s22 = sadd.s32 4294967295, %s2462_s1   ;;  %s2462_s1 = sphi %s2578_s1, %s30_s1  }
   0x7   : > { %p2257_p0 = scmp.ge.s32.totalorder %s2462_s1, 1  ;;  %p581_p1 = scmp.lt.s32.totalorder %s2462_s1, 3 }
   0x9   : > { %p582_p2 = pnand %p2257_p0, %p581_p1 }
   0xa   : > { %p647_p3 = scmp.lt.s32.totalorder (!%p582_p2), %s2253_s22, 1  ;;  %s3087_s2 = sld [smem:[#allocation6_spill]] (!%p582_p2) }
   0xb   : > { %585 = sbr.rel (%p582_p2) target bundleno = 4687 (0x124f), region = 100  ;;  %s3088_s21 = sld [smem:[#allocation3_spill]] (!%p582_p2) }
   0xc   : > { %s3089_s29 = sld [smem:[#allocation4_spill]] (!%p582_p2)  ;;  %s2467_s3 = smov (!%p582_p2), 96  }
   0xd   : > { %s3090_s25 = sld [smem:[#allocation7_spill]] (!%p582_p2)  ;;  %s2468_s26 = smov (!%p582_p2), 80  }
   0xe   : > { %s3091_s30 = sld [smem:[#allocation5_spill]] (!%p582_p2) }
  0x10   : > { %v685_v0 = vld [vmem:[%s3087_s2 + $0x60] sm:$0xf]  ;;  %vm754_vm0 = vcmask 1043456   ;;  %v2464_v1 = vmov 0   ;;  %v684_v2 = vld [vmem:[%s3087_s2 + $0x58] sm:$0xff]  ;;  %s3100_s22 = smov (!%p647_p3, %s2253_s22), 1  ;;  %v686_v19 = vlaneseq }
  0x11   : > { %2367 = vset.pattern.permute.xlu0 %v2464_v1  ;;  %2368 = vset.pattern.permute.xlu2 %v2464_v1  ;;  %v683_v3 = vld [vmem:[%s3087_s2 + $0x50] sm:$0xff]  ;;  %s2344_s28 = sshll.u32 %s3100_s22, 4  ;;  %v682_v4 = vld [vmem:[%s3087_s2 + $0x48] sm:$0xff]  ;;  %v681_v7 = vld [vmem:[%s3087_s2 + $0x40] sm:$0xff]  ;;  %vm720_vm1 = vcmask 1041408   ;;  %vm747_vm2 = vcmask 818176  }
  0x12   : > { %2271 = vmatpush.msk.msra.mxu1 %vm754_vm0, %v685_v0  ;;  %s651_s23 = scalar_lea.vmem %s3088_s21, %s2344_s28  ;;  %v680_v8 = vld [vmem:[%s3087_s2 + $0x38] sm:$0xff]  ;;  %s656_s1 = scalar_lea.vmem %s3089_s29, %s2344_s28  ;;  %v679_v9 = vld [vmem:[%s3087_s2 + $0x30] sm:$0xff]  ;;  %v678_v12 = vld [vmem:[%s3087_s2 + $0x28] sm:$0xff]  ;;  %v687_v20 = vand.u32 127, %v686_v19  ;;  %v2465_v23 = vmov 0.0   ;;  %vm713_vm5 = vcmask 15360  }
  0x13   : > { %v665_v5 = vld [vmem:[%s651_s23] sm:$0xff]  ;;  %v666_v6 = vld [vmem:[%s651_s23 + $0x8] sm:$0xff]  ;;  %v676_v14 = vld [vmem:[%s3087_s2 + $0x18] sm:$0xff]  ;;  %vm786_vm8 = vcmask 261120   ;;  %v2466_v41 = vmov 32.0   ;;  %vm888_vm0 = vcmask 130048  }
  0x14   : > { %762 = vmatpush.msra.mxu1 %v684_v2  ;;  %689 = vperm.xlu0 %2367, %v665_v5   ;;  %v667_v10 = vld [vmem:[%s656_s1] sm:$0xff]  ;;  %v668_v11 = vld [vmem:[%s656_s1 + $0x8] sm:$0xff]  ;;  %v675_v15 = vld [vmem:[%s3087_s2 + $0x10] sm:$0xff]  ;;  %2390 = vrcp.f32 %v2466_v41  ;;  %s2469_s1 = smov 112   ;;  %s3074_s27 = sshll.u32 %s3100_s22, 1 }
  0x15   : > { %692 = vperm.xlu2 %2368, %v666_v6   ;;  %v677_v13 = vld [vmem:[%s3087_s2 + $0x20] sm:$0xff]  ;;  %v674_v16 = vld [vmem:[%s3087_s2 + $0x8] sm:$0xff]  ;;  %v851_v58 = vld [vmem:[%s3059_s8 + $0x18] sm:$0xff]  ;;  %s660_s0 = scalar_lea.vmem %s3091_s30, %s3074_s27  ;;  %s3079_s21 = smov 64  }
  0x16   : > { %763 = vmatpush.msra.mxu1 %v683_v3  ;;  %v673_v17 = vld [vmem:[%s3087_s2] sm:$0xff]  ;;  %2346 = vmatpush.msra.mxu2 %v851_v58  ;;  %v850_v59 = vld [vmem:[%s3059_s8 + $0x10] sm:$0xff]  ;;  %v849_v60 = vld [vmem:[%s3059_s8 + $0x8] sm:$0xff]  ;;  %s3077_s23 = smov 48  }
  0x17   : > { %v700_v18 = vld [vmem:[%s3056_s5] sm:$0x3] }
  0x18   : > { %764 = vmatpush.msra.mxu1 %v682_v4  ;;  %2268 = vmatpush.msk.msra.mxu0 %vm720_vm1, %v700_v18  ;;  %v781_v32 = vld [vmem:[%s3090_s25] sm:$0xff]  ;;  %vm950_vm1 = vcmask 64512   ;;  %s3097_s25 = sshll.u32 %s3100_s22, 1 }
  0x19   : > { %2347 = vmatpush.msra.mxu2 %v850_v59  ;;  %v848_v61 = vld [vmem:[%s3059_s8] sm:$0xff] }
  0x1a   : > { %765 = vmatpush.msra.mxu1 %v681_v7  ;;  %v2391_v42 = vpop.eup %2390  ;;  %874 = vmatpush.msrb.mxu0 %v851_v58 }
  0x1b   : > { %v794_v43 = vmul.f32 32.0, %v2391_v42  ;;  %vm798_vm9 = vweird.f32 %v2391_v42  ;;  %2348 = vmatpush.msra.mxu2 %v849_v60 }
  0x1c   : > { %766 = vmatpush.msra.mxu1 %v680_v8  ;;  %702 = vperm.xlu0 %2367, %v667_v10  }
  0x1d   : > { %705 = vperm.xlu2 %2368, %v668_v11   ;;  %v795_v44 = vsub.f32 1.0, %v794_v43  ;;  %875 = vmatpush.msrb.mxu0 %v850_v59 }
  0x1e   : > { %767 = vmatpush.msra.mxu1 %v679_v9  ;;  %2349 = vmatpush.msra.mxu2 %v848_v61 }
  0x1f   : > { %v796_v45 = vmul.f32 %v2391_v42, %v795_v44  ;;  %876 = vmatpush.msrb.mxu0 %v849_v60 }
  0x20   : > { %768 = vmatpush.msra.mxu1 %v678_v12  ;;  %v2372_v12 = vld [vmem:[%s3057_s6] ss:$0 sm:$0xff] }
  0x21   : > { %v797_v46 = vadd.f32 %v2391_v42, %v796_v45  ;;  %877 = vmatpush.msrb.mxu0 %v848_v61 }
  0x22   : > { %769 = vmatpush.msra.mxu1 %v677_v13 }
  0x23   : > { %v2643_v47 = vsel %vm798_vm9, %v2391_v42, %v797_v46 }
  0x24   : > { %770 = vmatpush.msra.mxu1 %v676_v14 }
  0x26   : > { %771 = vmatpush.msra.mxu1 %v675_v15 }
  0x28   : > { %772 = vmatpush.msra.mxu1 %v674_v16  ;;  %v2373_v16 = vld [vmem:[%s3058_s7] ss:$0 sm:$0xff] }
  0x2a   : > { %773 = vmatpush.msra.mxu1 %v673_v17 }
  0x6f   : > { %v693_v22 = vpop.permute.xlu2 %692 }
  0x70   : > { %vm695_vm4 = vcmp.eq.s32.totalorder %v693_v22, %v687_v20 }
  0x71   : > { %v2265_v25 = vsel %vm695_vm4, 1.0, %v2465_v23 }
  0x77   : > { %v706_v28 = vpop.permute.xlu2 %705 }
  0x78   : > { %vm708_vm7 = vcmp.eq.s32.totalorder %v706_v28, %v687_v20 }
  0x79   : > { %v2267_v29 = vsel %vm708_vm7, 1.0, %v2465_v23 }
  0x86   : > { %v690_v21 = vpop.permute.xlu0 %689 }
  0x87   : > { %vm694_vm3 = vcmp.eq.s32.totalorder %v690_v21, %v687_v20 }
  0x88   : > { %v2264_v24 = vsel %vm694_vm3, 1.0, %v2465_v23 }
  0x89   : > { %2272 = vmatmul.msk.f32.vlgmr.msra.gmra.mxu1 %vm747_vm2, %v2264_v24 }
  0x8e   : > { %v703_v26 = vpop.permute.xlu0 %702 }
  0x8f   : > { %vm707_vm6 = vcmp.eq.s32.totalorder %v703_v26, %v687_v20 }
  0x90   : > { %v2266_v27 = vsel %vm707_vm6, 1.0, %v2465_v23 }
  0x91   : > { %2269 = vmatmul.msk.f32.vlgmr.msra.gmra.mxu0 %vm713_vm5, %v2266_v27  ;;  %2273 = vmatmul.msk.f32.gmra.mxu1 %vm747_vm2, %v2265_v25  ;;  %v2374_v27 = vld [vmem:[%s3060_s9] ss:$0 sm:$0xff] }
  0x99   : > { %2270 = vmatmul.msk.f32.gmra.mxu0 %vm713_vm5, %v2267_v29 }
 0x106   : > { %v775_v30 = vpop.f32.mrf.mxu1 }
 0x10e   : > { %v741_v31 = vpop.f32.mrf.mxu0  ;;  %v778_v36 = vpop.f32.mrf.mxu1 }
 0x10f   : > { %v776_v33 = vadd.f32 %v775_v30, %v741_v31 }
 0x111   : > { %v782_v34 = vadd.f32 %v781_v32, %v776_v33 }
 0x113   : > { %v787_v35 = vsel %vm786_vm8, %v782_v34, 0.0 }
 0x114   : > { %788 = vadd.xlane.f32.xlu1 %v787_v35 }
 0x116   : > { %v744_v37 = vpop.f32.mrf.mxu0 }
 0x117   : > { %v779_v38 = vadd.f32 %v778_v36, %v744_v37  ;;  %v669_v36 = vld [vmem:[%s660_s0] sm:$0x3]  ;;  %s3075_s0 = smov 16  }
 0x118   : > { %v2708_v37 = vcvt.s32.f32 %v669_v36 }
 0x119   : > { %v783_v39 = vadd.f32 %v781_v32, %v779_v38 }
 0x11a   : > { %v671_v38 = vsub.f32 1.0, %v2708_v37 }
 0x11b   : > { %v790_v40 = vsel %vm786_vm8, %v783_v39, 0.0 }
 0x11c   : > { %791 = vadd.xlane.f32.xlu0 %v790_v40 }
 0x187   : > { %v789_v48 = vpop.xlane.xlu1 %788 }
 0x188   : > { %v800_v49 = vmul.f32 %v2643_v47, %v789_v48 }
 0x18a   : > { %v802_v50 = vsub.f32 %v782_v34, %v800_v49 }
 0x18c   : > { %v804_v51 = vmul.f32 %v802_v50, %v802_v50 }
 0x18e   : > { %v806_v52 = vsel %vm786_vm8, %v804_v51, 0.0 }
 0x18f   : > { %807 = vadd.xlane.f32.xlu1 %v806_v52  ;;  %v792_v53 = vpop.xlane.xlu0 %791 }
 0x190   : > { %v801_v54 = vmul.f32 %v2643_v47, %v792_v53 }
 0x192   : > { %v803_v55 = vsub.f32 %v783_v39, %v801_v54  ;;  %v672_v39 = vmul.f32 -10000.0, %v671_v38 }
 0x194   : > { %v805_v56 = vmul.f32 %v803_v55, %v803_v55  ;;  %v2711_v40 = vperm.slane %v672_v39, 0  ;;  %v943_v45 = vrot.slane %v672_v39, 1 }
 0x196   : > { %v809_v57 = vsel %vm786_vm8, %v805_v56, 0.0  ;;  %v2715_v46 = vperm.slane %v943_v45, 0 }
 0x197   : > { %810 = vadd.xlane.f32.xlu2 %v809_v57 }
 0x202   : > { %v808_v62 = vpop.xlane.xlu1 %807 }
 0x203   : > { %v812_v63 = vmul.f32 %v808_v62, %v2643_v47 }
 0x205   : > { %v814_v0 = vadd.f32 1e-12, %v812_v63 }
 0x207   : > { %2392 = vrsqrt.f32 %v814_v0  ;;  %vm822_vm11 = vweird.f32 %v814_v0 }
 0x20a   : > { %v811_v1 = vpop.xlane.xlu2 %810 }
 0x20b   : > { %v813_v2 = vmul.f32 %v811_v1, %v2643_v47 }
 0x20d   : > { %v2393_v3 = vpop.eup %2392  ;;  %v815_v4 = vadd.f32 1e-12, %v813_v2 }
 0x20e   : > { %v817_v5 = vmul.f32 %v2393_v3, %v814_v0  ;;  %vm823_vm10 = vweird.f32 %v2393_v3 }
 0x20f   : > { %2394 = vrsqrt.f32 %v815_v4  ;;  %vm824_vm12 = vmor %vm822_vm11, %vm823_vm10  ;;  %vm832_vm13 = vweird.f32 %v815_v4 }
 0x210   : > { %v818_v6 = vmul.f32 %v2393_v3, %v817_v5 }
 0x212   : > { %v819_v7 = vmul.f32 0.5, %v818_v6 }
 0x214   : > { %v820_v8 = vsub.f32 1.5, %v819_v7 }
 0x215   : > { %v2395_v9 = vpop.eup %2394 }
 0x216   : > { %v821_v10 = vmul.f32 %v2393_v3, %v820_v8  ;;  %v827_v11 = vmul.f32 %v2395_v9, %v815_v4  ;;  %vm833_vm14 = vweird.f32 %v2395_v9 }
 0x217   : > { %vm834_vm15 = vmor %vm832_vm13, %vm833_vm14 }
 0x218   : > { %v825_v13 = vsel %vm824_vm12, %v2393_v3, %v821_v10  ;;  %v828_v14 = vmul.f32 %v2395_v9, %v827_v11 }
 0x219   : > { %v836_v15 = vmul.f32 %v825_v13, %v802_v50 }
 0x21a   : > { %v829_v17 = vmul.f32 0.5, %v828_v14 }
 0x21b   : > { %v841_v18 = vmul.f32 %v2372_v12, %v836_v15 }
 0x21c   : > { %v830_v20 = vsub.f32 1.5, %v829_v17 }
 0x21d   : > { %v2669_v21 = vadd.f32 %v2373_v16, %v841_v18 }
 0x21e   : > { %v831_v22 = vmul.f32 %v2395_v9, %v830_v20 }
 0x21f   : > { %2274 = vmatmul.msk.f32.vlgmr.msrb.gmra.mxu0 %vm786_vm8, %v2669_v21 }
 0x220   : > { %v835_v23 = vsel %vm834_vm15, %v2395_v9, %v831_v22 }
 0x221   : > { %v837_v24 = vmul.f32 %v835_v23, %v803_v55 }
 0x223   : > { %v842_v25 = vmul.f32 %v2372_v12, %v837_v24 }
 0x225   : > { %v2673_v26 = vadd.f32 %v2373_v16, %v842_v25 }
 0x227   : > { %2275 = vmatmul.msk.f32.vlgmr.msra.gmra.mxu2 %vm786_vm8, %v2673_v26 }
 0x29c   : > { %v879_v28 = vpop.f32.mrf.mxu0 }
 0x29d   : > { %v2680_v29 = vadd.f32 %v2374_v27, %v879_v28 }
 0x29f   : > { %886 = vrot.lane.b32.xlu1 %v2680_v29, %s2467_s3  ;;  %1053 = vrot.lane.b32.xlu2 %v2680_v29, %s2468_s26 }
 0x2aa   : > { %v882_v30 = vpop.f32.mrf.mxu2 }
 0x2ab   : > { %v2686_v31 = vadd.f32 %v2374_v27, %v882_v30 }
 0x2ad   : > { %914 = vrot.lane.b32.xlu0 %v2686_v31, %s2467_s3 }
 0x2b5   : > { %1051 = vrot.lane.b32.xlu0 %v2680_v29, %s2469_s1 }
 0x2bd   : > { %1081 = vrot.lane.b32.xlu0 %v2686_v31, %s2468_s26 }
 0x2f9   : > { %v1054_v32 = vpop.permute.xlu2 %1053 }
 0x2fa   : > { %2282 = vmatpush.xpose.msk.msrb.mxu2 %vm888_vm0, %v1054_v32 }
 0x311   : > { %v887_v33 = vpop.permute.xlu1 %886 }
 0x312   : > { %2276 = vmatpush.xpose.msk.msra.mxu3 %vm888_vm0, %v887_v33 }
 0x315   : > { %2277 = vmatmul.msk.f32.vlgmr.msra.gmra.mxu3 %vm888_vm0, %v2680_v29 }
 0x31f   : > { %v915_v34 = vpop.permute.xlu0 %914 }
 0x320   : > { %2278 = vmatpush.xpose.msk.msrb.mxu3 %vm888_vm0, %v915_v34 }
 0x323   : > { %2279 = vmatmul.msk.f32.vlgmr.msrb.gmra.mxu3 %vm888_vm0, %v2686_v31 }
 0x327   : > { %v1052_v35 = vpop.permute.xlu0 %1051 }
 0x328   : > { %2283 = vmatmul.msk.f32.vlgmr.msrb.gmra.mxu2 %vm888_vm0, %v1052_v35 }
 0x32f   : > { %v1082_v55 = vpop.permute.xlu0 %1081 }
 0x398   : > { %v910_v41 = vpop.f32.mrf.mxu3 }
 0x399   : > { %v940_v42 = vmul.f32 0.25, %v910_v41 }
 0x39b   : > { %v948_v43 = vadd.f32 %v2711_v40, %v940_v42 }
 0x39d   : > { %v951_v44 = vsel %vm950_vm1, %v948_v43, -inf }
 0x39e   : > { %952 = vmax.xlane.f32.xlu1 %v951_v44 }
 0x3a6   : > { %v937_v48 = vpop.f32.mrf.mxu3 }
 0x3a7   : > { %v941_v49 = vmul.f32 0.25, %v937_v48 }
 0x3a9   : > { %v949_v50 = vadd.f32 %v2715_v46, %v941_v49 }
 0x3ab   : > { %v954_v51 = vsel %vm950_vm1, %v949_v50, -inf  ;;  %v1076_v0 = vpop.f32.mrf.mxu2 }
 0x3ac   : > { %955 = vmax.xlane.f32.xlu0 %v954_v51  ;;  %v1107_v1 = vmul.f32 0.25, %v1076_v0 }
 0x3ae   : > { %v1109_v2 = vadd.f32 %v1107_v1, %v2711_v40 }
 0x3b0   : > { %v1111_v3 = vsel %vm950_vm1, %v1109_v2, -inf }
 0x3b7   : > { %999 = vrot.lane.b32.xlu1 %v2680_v29, %s3079_s21 }
 0x411   : > { %v953_v52 = vpop.xlane.xlu1 %952 }
 0x412   : > { %v957_v53 = vsub.f32 %v948_v43, %v953_v52 }
 0x414   : > { %v959_v54 = vmul.f32 1.442695, %v957_v53 }
 0x416   : > { %2396 = vpow2.f32 %v959_v54 }
 0x41c   : > { %v2397_v56 = vpop.eup %2396 }
 0x41d   : > { %v963_v57 = vsel %vm950_vm1, %v2397_v56, 0.0 }
 0x41e   : > { %964 = vadd.xlane.f32.xlu2 %v963_v57 }
 0x41f   : > { %v956_v58 = vpop.xlane.xlu0 %955 }
 0x420   : > { %v958_v59 = vsub.f32 %v949_v50, %v956_v58 }
 0x422   : > { %v961_v60 = vmul.f32 1.442695, %v958_v59 }
 0x424   : > { %2398 = vpow2.f32 %v961_v60 }
 0x429   : > { %v1000_v61 = vpop.permute.xlu1 %999 }
 0x42a   : > { %v2722_v62 = vpop.eup %2398  ;;  %1020 = vmatpush.msra.mxu0 %v1000_v61 }
 0x42b   : > { %v966_v63 = vsel %vm950_vm1, %v2722_v62, 0.0 }
 0x42c   : > { %2284 = vmatpush.xpose.msk.msrb.mxu0 %vm888_vm0, %v1082_v55  ;;  %967 = vadd.xlane.f32.xlu0 %v966_v63 }
 0x436   : > { %1079 = vrot.lane.b32.xlu2 %v2686_v31, %s2469_s1 }
 0x45f   : > { %1112 = vmax.xlane.f32.xlu2 %v1111_v3  ;;  %v1223_v3 = vld [vmem:[%s3061_s10 + $0x10] sm:$0xff] }
 0x491   : > { %v965_v4 = vpop.xlane.xlu2 %964 }
 0x492   : > { %2400 = vrcp.f32 %v965_v4  ;;  %v980_v8 = vand.u32 2147483648, %v965_v4  ;;  %v978_v10 = vand.u32 2147483647, %v965_v4  ;;  %vm974_vm3 = vweird.f32 %v965_v4 }
 0x494   : > { %v981_v12 = vor.u32 1.1754944e-38, %v980_v8  ;;  %vm979_vm5 = vcmp.eq.f32.partialorder %v978_v10, 8.507059e+37 }
 0x498   : > { %v2401_v5 = vpop.eup %2400 }
 0x499   : > { %v970_v6 = vmul.f32 %v2401_v5, %v965_v4  ;;  %vm975_vm2 = vweird.f32 %v2401_v5  ;;  %v1080_v16 = vpop.permute.xlu2 %1079 }
 0x49a   : > { %vm976_vm4 = vmor %vm974_vm3, %vm975_vm2 }
 0x49b   : > { %v971_v7 = vsub.f32 1.0, %v970_v6 }
 0x49d   : > { %v972_v9 = vmul.f32 %v2401_v5, %v971_v7 }
 0x49f   : > { %v973_v11 = vadd.f32 %v2401_v5, %v972_v9  ;;  %v968_v32 = vpop.xlane.xlu0 %967 }
 0x4a0   : > { %v995_v39 = vand.u32 2147483648, %v968_v32  ;;  %vm989_vm7 = vweird.f32 %v968_v32  ;;  %v993_v41 = vand.u32 2147483647, %v968_v32 }
 0x4a1   : > { %v977_v13 = vsel %vm976_vm4, %v2401_v5, %v973_v11  ;;  %v1222_v5 = vld [vmem:[%s3061_s10 + $0x8] sm:$0xff] }
 0x4a2   : > { %v982_v14 = vsel %vm979_vm5, %v981_v12, %v977_v13  ;;  %v996_v44 = vor.u32 1.1754944e-38, %v995_v39  ;;  %vm994_vm10 = vcmp.eq.f32.partialorder %v993_v41, 8.507059e+37 }
 0x4a3   : > { %v983_v15 = vmul.f32 %v2397_v56, %v982_v14 }
 0x4a5   : > { %2280 = vmatmul.msk.f32.vlgmr.msra.gmra.mxu0 %vm950_vm1, %v983_v15 }
 0x4ad   : > { %2285 = vmatmul.msk.f32.vlgmr.msrb.gmra.mxu0 %vm888_vm0, %v1080_v16 }
 0x4d2   : > { %v1113_v17 = vpop.xlane.xlu2 %1112 }
 0x4d3   : > { %v1117_v18 = vsub.f32 %v1109_v2, %v1113_v17  ;;  %v1224_v2 = vld [vmem:[%s3061_s10 + $0x18] sm:$0xff] }
 0x4d4   : > { %1247 = vmatpush.msra.mxu0 %v1224_v2 }
 0x4d5   : > { %v1119_v20 = vmul.f32 1.442695, %v1117_v18 }
 0x4d6   : > { %1248 = vmatpush.msra.mxu0 %v1223_v3 }
 0x4d7   : > { %2402 = vpow2.f32 %v1119_v20  ;;  %v1221_v20 = vld [vmem:[%s3061_s10] sm:$0xff] }
 0x4d8   : > { %2404 = vrcp.f32 %v968_v32  ;;  %1249 = vmatpush.msra.mxu0 %v1222_v5 }
 0x4da   : > { %1250 = vmatpush.msra.mxu0 %v1221_v20 }
 0x4dd   : > { %v2403_v22 = vpop.eup %2402 }
 0x4de   : > { %v1123_v23 = vsel %vm950_vm1, %v2403_v22, 0.0  ;;  %v2405_v33 = vpop.eup %2404 }
 0x4df   : > { %1124 = vadd.xlane.f32.xlu2 %v1123_v23  ;;  %v985_v34 = vmul.f32 %v2405_v33, %v968_v32  ;;  %vm990_vm6 = vweird.f32 %v2405_v33 }
 0x4e0   : > { %vm991_vm9 = vmor %vm989_vm7, %vm990_vm6 }
 0x4e1   : > { %v986_v35 = vsub.f32 1.0, %v985_v34 }
 0x4e3   : > { %v987_v36 = vmul.f32 %v2405_v33, %v986_v35 }
 0x4e5   : > { %v988_v38 = vadd.f32 %v2405_v33, %v987_v36 }
 0x4e7   : > { %v992_v43 = vsel %vm991_vm9, %v2405_v33, %v988_v38 }
 0x4e8   : > { %v997_v45 = vsel %vm994_vm10, %v996_v44, %v992_v43 }
 0x4e9   : > { %v998_v49 = vmul.f32 %v2722_v62, %v997_v45 }
 0x4f7   : > { %1025 = vrot.lane.b32.xlu2 %v2686_v31, %s3079_s21 }
 0x522   : > { %v2736_v24 = vpop.f32.mrf.mxu0 }
 0x52a   : > { %v1104_v25 = vpop.f32.mrf.mxu0 }
 0x52b   : > { %v1108_v27 = vmul.f32 0.25, %v1104_v25 }
 0x52d   : > { %v1110_v28 = vadd.f32 %v1108_v27, %v2715_v46  ;;  %v2375_v27 = vld [vmem:[%s3062_s11] ss:$0 sm:$0xff] }
 0x52f   : > { %v1114_v30 = vsel %vm950_vm1, %v1110_v28, -inf }
 0x530   : > { %1115 = vmax.xlane.f32.xlu1 %v1114_v30 }
 0x549   : > { %1159 = vrot.lane.b32.xlu1 %v2680_v29, %s3077_s23 }
 0x552   : > { %v1125_v42 = vpop.xlane.xlu2 %1124 }
 0x553   : > { %2406 = vrcp.f32 %v1125_v42  ;;  %v1140_v59 = vand.u32 2147483648, %v1125_v42  ;;  %vm1134_vm12 = vweird.f32 %v1125_v42  ;;  %v1138_v60 = vand.u32 2147483647, %v1125_v42 }
 0x555   : > { %v1141_v62 = vor.u32 1.1754944e-38, %v1140_v59  ;;  %vm1139_vm14 = vcmp.eq.f32.partialorder %v1138_v60, 8.507059e+37  ;;  %v2376_v60 = vld [vmem:[%s3063_s12] ss:$0 sm:$0xff] }
 0x559   : > { %v2407_v29 = vpop.eup %2406 }
 0x55a   : > { %v1026_v48 = vpop.permute.xlu2 %1025  ;;  %v1130_v52 = vmul.f32 %v2407_v29, %v1125_v42  ;;  %vm1135_vm11 = vweird.f32 %v2407_v29 }
 0x55b   : > { %1046 = vmatpush.msra.mxu3 %v1026_v48  ;;  %vm1136_vm13 = vmor %vm1134_vm12, %vm1135_vm11  ;;  %v1319_v48 = vld [vmem:[%s3065_s14 + $0x18] sm:$0xff]  ;;  %vm1383_vm12 = vcmask 523264  }
 0x55c   : > { %2281 = vmatmul.msk.f32.vlgmr.msra.gmra.mxu3 %vm950_vm1, %v998_v49  ;;  %v1131_v54 = vsub.f32 1.0, %v1130_v52  ;;  %v1318_v49 = vld [vmem:[%s3065_s14 + $0x10] sm:$0xff] }
 0x55e   : > { %v1132_v55 = vmul.f32 %v2407_v29, %v1131_v54 }
 0x560   : > { %v1133_v58 = vadd.f32 %v2407_v29, %v1132_v55 }
 0x562   : > { %v1137_v61 = vsel %vm1136_vm13, %v2407_v29, %v1133_v58  ;;  %v1317_v29 = vld [vmem:[%s3065_s14 + $0x8] sm:$0xff] }
 0x563   : > { %v1142_v63 = vsel %vm1139_vm14, %v1141_v62, %v1137_v61 }
 0x564   : > { %v1143_v1 = vmul.f32 %v2403_v22, %v1142_v63  ;;  %v2377_v63 = vld [vmem:[%s3064_s13] ss:$0 sm:$0xff] }
 0x5a3   : > { %v1116_v50 = vpop.xlane.xlu1 %1115 }
 0x5a4   : > { %v1118_v51 = vsub.f32 %v1110_v28, %v1116_v50  ;;  %v1316_v50 = vld [vmem:[%s3065_s14] sm:$0xff] }
 0x5a6   : > { %v1121_v53 = vmul.f32 1.442695, %v1118_v51 }
 0x5a8   : > { %2408 = vpow2.f32 %v1121_v53 }
 0x5ae   : > { %v2409_v56 = vpop.eup %2408 }
 0x5af   : > { %v1126_v57 = vsel %vm950_vm1, %v2409_v56, 0.0 }
 0x5b0   : > { %1127 = vadd.xlane.f32.xlu0 %v1126_v57 }
 0x5bb   : > { %v1160_v0 = vpop.permute.xlu1 %1159 }
 0x5bc   : > { %1180 = vmatpush.msrb.mxu3 %v1160_v0 }
 0x5bd   : > { %2286 = vmatmul.msk.f32.vlgmr.msrb.gmra.mxu3 %vm950_vm1, %v1143_v1 }
 0x5be   : > { %1342 = vmatpush.msra.mxu3 %v1319_v48  ;;  %v2379_v48 = vld [vmem:[%s3068_s17] ss:$0 sm:$0xff] }
 0x5c0   : > { %1343 = vmatpush.msra.mxu3 %v1318_v49 }
 0x5c2   : > { %1344 = vmatpush.msra.mxu3 %v1317_v29 }
 0x5c4   : > { %1185 = vrot.lane.b32.xlu0 %v2686_v31, %s3077_s23  ;;  %1345 = vmatpush.msra.mxu3 %v1316_v50 }
 0x5df   : > { %v1048_v17 = vpop.f32.mrf.mxu3 }
 0x623   : > { %v1128_v4 = vpop.xlane.xlu0 %1127 }
 0x624   : > { %2410 = vrcp.f32 %v1128_v4  ;;  %v1155_v8 = vand.u32 2147483648, %v1128_v4  ;;  %v1153_v10 = vand.u32 2147483647, %v1128_v4  ;;  %vm1149_vm2 = vweird.f32 %v1128_v4 }
 0x626   : > { %v1156_v12 = vor.u32 1.1754944e-38, %v1155_v8  ;;  %vm1154_vm4 = vcmp.eq.f32.partialorder %v1153_v10, 8.507059e+37  ;;  %v1376_v8 = vld [vmem:[%s3067_s16 + $0x28] sm:$0xff]  ;;  %v1374_v10 = vld [vmem:[%s3067_s16 + $0x18] sm:$0xff] }
 0x62a   : > { %v2411_v6 = vpop.eup %2410 }
 0x62b   : > { %v1145_v7 = vmul.f32 %v2411_v6, %v1128_v4  ;;  %vm1150_vm15 = vweird.f32 %v2411_v6 }
 0x62c   : > { %vm1151_vm3 = vmor %vm1149_vm2, %vm1150_vm15 }
 0x62d   : > { %v1146_v31 = vsub.f32 1.0, %v1145_v7  ;;  %v1378_v7 = vld [vmem:[%s3067_s16 + $0x38] sm:$0xff] }
 0x62e   : > { %1398 = vmatpush.msrb.mxu1 %v1378_v7 }
 0x62f   : > { %v1147_v9 = vmul.f32 %v2411_v6, %v1146_v31  ;;  %v1377_v31 = vld [vmem:[%s3067_s16 + $0x30] sm:$0xff] }
 0x630   : > { %1399 = vmatpush.msrb.mxu1 %v1377_v31  ;;  %v2297_v31 = vld [vmem:[%s3059_s8 + $0x38] sm:$0xff] }
 0x631   : > { %v1148_v11 = vadd.f32 %v2411_v6, %v1147_v9  ;;  %v1375_v9 = vld [vmem:[%s3067_s16 + $0x20] sm:$0xff] }
 0x632   : > { %1400 = vmatpush.msrb.mxu1 %v1376_v8  ;;  %v2296_v8 = vld [vmem:[%s3059_s8 + $0x30] sm:$0xff] }
 0x633   : > { %v1152_v13 = vsel %vm1151_vm3, %v2411_v6, %v1148_v11  ;;  %v1373_v11 = vld [vmem:[%s3067_s16 + $0x10] sm:$0xff] }
 0x634   : > { %v1157_v14 = vsel %vm1154_vm4, %v1156_v12, %v1152_v13  ;;  %1401 = vmatpush.msrb.mxu1 %v1375_v9  ;;  %v1372_v12 = vld [vmem:[%s3067_s16 + $0x8] sm:$0xff] }
 0x635   : > { %v1158_v15 = vmul.f32 %v2409_v56, %v1157_v14  ;;  %v2295_v9 = vld [vmem:[%s3059_s8 + $0x28] sm:$0xff] }
 0x636   : > { %v1186_v16 = vpop.permute.xlu0 %1185  ;;  %1402 = vmatpush.msrb.mxu1 %v1374_v10  ;;  %v2294_v10 = vld [vmem:[%s3059_s8 + $0x20] sm:$0xff] }
 0x637   : > { %1206 = vmatpush.msra.mxu2 %v1186_v16 }
 0x638   : > { %2287 = vmatmul.msk.f32.vlgmr.msra.gmra.mxu2 %vm950_vm1, %v1158_v15  ;;  %1403 = vmatpush.msrb.mxu1 %v1373_v11  ;;  %v1371_v15 = vld [vmem:[%s3067_s16] sm:$0xff] }
 0x639   : > { %1499 = vmatpush.msrb.mxu2 %v2297_v31 }
 0x63a   : > { %1404 = vmatpush.msrb.mxu1 %v1372_v12 }
 0x63b   : > { %1500 = vmatpush.msrb.mxu2 %v2296_v8 }
 0x63c   : > { %1405 = vmatpush.msrb.mxu1 %v1371_v15 }
 0x63d   : > { %1501 = vmatpush.msrb.mxu2 %v2295_v9 }
 0x63f   : > { %1502 = vmatpush.msrb.mxu2 %v2294_v10 }
 0x640   : > { %v1182_v18 = vpop.f32.mrf.mxu3 }
 0x641   : > { %1213 = vrot.lane.b32.xlu2 %v1182_v18, %s3075_s0 }
 0x69b   : > { %v1214_v22 = vpop.permute.xlu2 %1213 }
 0x69c   : > { %v1219_v23 = vsel %vm888_vm0, %v2736_v24, %v1214_v22 }
 0x69d   : > { %2288 = vmatmul.msk.f32.vlgmr.msra.gmra.mxu0 %vm786_vm8, %v1219_v23 }
 0x6bb   : > { %v1208_v25 = vpop.f32.mrf.mxu2 }
 0x6bc   : > { %1215 = vrot.lane.b32.xlu0 %v1208_v25, %s3075_s0  ;;  %s3094_s0 = smov 16  }
 0x71a   : > { %v1252_v28 = vpop.f32.mrf.mxu0 }
 0x71b   : > { %v1253_v30 = vadd.f32 %v2375_v27, %v1252_v28 }
 0x71d   : > { %v1258_v32 = vadd.f32 %v1253_v30, %v2669_v21 }
 0x71f   : > { %v1262_v33 = vsel %vm786_vm8, %v1258_v32, 0.0 }
 0x720   : > { %1263 = vadd.xlane.f32.xlu1 %v1262_v33 }
 0x72e   : > { %v1216_v34 = vpop.permute.xlu0 %1215 }
 0x72f   : > { %v1220_v35 = vsel %vm888_vm0, %v1048_v17, %v1216_v34  ;;  %v2378_v17 = vld [vmem:[%s3066_s15] ss:$0 sm:$0xff] }
 0x730   : > { %2289 = vmatmul.msk.f32.gmra.mxu0 %vm786_vm8, %v1220_v35 }
 0x793   : > { %v1264_v24 = vpop.xlane.xlu1 %1263 }
 0x794   : > { %v1268_v36 = vmul.f32 %v1264_v24, %v2643_v47 }
 0x796   : > { %v1270_v38 = vsub.f32 %v1258_v32, %v1268_v36 }
 0x798   : > { %v1272_v39 = vmul.f32 %v1270_v38, %v1270_v38 }
 0x79a   : > { %v1274_v41 = vsel %vm786_vm8, %v1272_v39, 0.0 }
 0x79b   : > { %1275 = vadd.xlane.f32.xlu0 %v1274_v41 }
 0x7ad   : > { %v1255_v42 = vpop.f32.mrf.mxu0 }
 0x7ae   : > { %v1256_v43 = vadd.f32 %v2375_v27, %v1255_v42 }
 0x7b0   : > { %v1259_v44 = vadd.f32 %v1256_v43, %v2673_v26 }
 0x7b2   : > { %v1265_v45 = vsel %vm786_vm8, %v1259_v44, 0.0 }
 0x7b3   : > { %1266 = vadd.xlane.f32.xlu2 %v1265_v45 }
 0x80e   : > { %v1276_v51 = vpop.xlane.xlu0 %1275 }
 0x80f   : > { %v1280_v52 = vmul.f32 %v1276_v51, %v2643_v47 }
 0x811   : > { %v1282_v53 = vadd.f32 1e-12, %v1280_v52 }
 0x813   : > { %2412 = vrsqrt.f32 %v1282_v53  ;;  %vm1290_vm6 = vweird.f32 %v1282_v53 }
 0x819   : > { %v2413_v54 = vpop.eup %2412 }
 0x81a   : > { %v1285_v55 = vmul.f32 %v2413_v54, %v1282_v53  ;;  %vm1291_vm5 = vweird.f32 %v2413_v54 }
 0x81b   : > { %vm1292_vm7 = vmor %vm1290_vm6, %vm1291_vm5 }
 0x81c   : > { %v1286_v56 = vmul.f32 %v2413_v54, %v1285_v55 }
 0x81e   : > { %v1287_v57 = vmul.f32 0.5, %v1286_v56 }
 0x820   : > { %v1288_v58 = vsub.f32 1.5, %v1287_v57 }
 0x822   : > { %v1289_v59 = vmul.f32 %v2413_v54, %v1288_v58 }
 0x824   : > { %v1293_v61 = vsel %vm1292_vm7, %v2413_v54, %v1289_v59 }
 0x825   : > { %v1304_v62 = vmul.f32 %v1293_v61, %v1270_v38 }
 0x826   : > { %v1267_v0 = vpop.xlane.xlu2 %1266 }
 0x827   : > { %v1309_v1 = vmul.f32 %v2376_v60, %v1304_v62  ;;  %v1269_v2 = vmul.f32 %v1267_v0, %v2643_v47 }
 0x829   : > { %v1271_v3 = vsub.f32 %v1259_v44, %v1269_v2  ;;  %v1314_v4 = vadd.f32 %v2377_v63, %v1309_v1 }
 0x82b   : > { %2290 = vmatmul.msk.f32.vlgmr.msra.gmra.mxu3 %vm786_vm8, %v1314_v4  ;;  %v1273_v5 = vmul.f32 %v1271_v3, %v1271_v3 }
 0x82d   : > { %v1277_v6 = vsel %vm786_vm8, %v1273_v5, 0.0 }
 0x82e   : > { %1278 = vadd.xlane.f32.xlu1 %v1277_v6 }
 0x8a1   : > { %v1279_v13 = vpop.xlane.xlu1 %1278 }
 0x8a2   : > { %v1281_v14 = vmul.f32 %v1279_v13, %v2643_v47 }
 0x8a4   : > { %v1283_v16 = vadd.f32 1e-12, %v1281_v14 }
 0x8a6   : > { %2414 = vrsqrt.f32 %v1283_v16  ;;  %vm1300_vm10 = vweird.f32 %v1283_v16 }
 0x8ac   : > { %v2415_v18 = vpop.eup %2414 }
 0x8ad   : > { %v1295_v20 = vmul.f32 %v2415_v18, %v1283_v16  ;;  %vm1301_vm9 = vweird.f32 %v2415_v18 }
 0x8ae   : > { %v1347_v22 = vpop.f32.mrf.mxu3  ;;  %vm1302_vm11 = vmor %vm1300_vm10, %vm1301_vm9 }
 0x8af   : > { %v1296_v23 = vmul.f32 %v2415_v18, %v1295_v20  ;;  %v1348_v25 = vadd.f32 %v2378_v17, %v1347_v22  ;;  %v2380_v22 = vld [vmem:[%s3069_s18] ss:$0 sm:$0xff] }
 0x8b1   : > { %v1297_v27 = vmul.f32 0.5, %v1296_v23  ;;  %v1355_v28 = vmul.f32 0.044715, %v1348_v25  ;;  %v1353_v43 = vmul.f32 0.5, %v1348_v25 }
 0x8b3   : > { %v1298_v30 = vsub.f32 1.5, %v1297_v27  ;;  %v1357_v32 = vmul.f32 %v1355_v28, %v1348_v25  ;;  %v2381_v27 = vld [vmem:[%s3070_s19] ss:$0 sm:$0xff] }
 0x8b5   : > { %v1299_v33 = vmul.f32 %v2415_v18, %v1298_v30  ;;  %v1359_v34 = vmul.f32 %v1357_v32, %v1348_v25 }
 0x8b7   : > { %v1303_v35 = vsel %vm1302_vm11, %v2415_v18, %v1299_v33  ;;  %v1361_v24 = vadd.f32 %v1359_v34, %v1348_v25 }
 0x8b8   : > { %v1305_v36 = vmul.f32 %v1303_v35, %v1271_v3 }
 0x8b9   : > { %v1363_v38 = vmul.f32 0.7978846, %v1361_v24 }
 0x8ba   : > { %v1310_v39 = vmul.f32 %v2376_v60, %v1305_v36 }
 0x8bb   : > { %2416 = vtanh.f32 %v1363_v38 }
 0x8bc   : > { %v1315_v41 = vadd.f32 %v2377_v63, %v1310_v39 }
 0x8be   : > { %2291 = vmatmul.msk.f32.gmra.mxu3 %vm786_vm8, %v1315_v41 }
 0x8c1   : > { %v2417_v42 = vpop.eup %2416 }
 0x8c2   : > { %v1367_v44 = vadd.f32 1.0, %v2417_v42 }
 0x8c4   : > { %v1369_v45 = vmul.f32 %v1367_v44, %v1353_v43 }
 0x8c6   : > { %2292 = vmatmul.msk.f32.vlgmr.msrb.gmra.mxu1 %vm1383_vm12, %v1369_v45 }
 0x941   : > { %v1350_v49 = vpop.f32.mrf.mxu3 }
 0x942   : > { %v1351_v29 = vadd.f32 %v2378_v17, %v1350_v49 }
 0x943   : > { %v1407_v50 = vpop.f32.mrf.mxu1 }
 0x944   : > { %v1356_v51 = vmul.f32 0.044715, %v1351_v29  ;;  %v1408_v52 = vadd.f32 %v2379_v48, %v1407_v50  ;;  %v1354_v60 = vmul.f32 0.5, %v1351_v29 }
 0x946   : > { %v1413_v53 = vadd.f32 %v1408_v52, %v1314_v4  ;;  %v1358_v54 = vmul.f32 %v1356_v51, %v1351_v29 }
 0x948   : > { %v1417_v55 = vsel %vm786_vm8, %v1413_v53, 0.0  ;;  %v1360_v56 = vmul.f32 %v1358_v54, %v1351_v29 }
 0x949   : > { %1418 = vadd.xlane.f32.xlu2 %v1417_v55 }
 0x94a   : > { %v1362_v57 = vadd.f32 %v1360_v56, %v1351_v29 }
 0x94c   : > { %v1364_v58 = vmul.f32 0.7978846, %v1362_v57 }
 0x94e   : > { %2418 = vtanh.f32 %v1364_v58 }
 0x954   : > { %v2419_v59 = vpop.eup %2418 }
 0x955   : > { %v1368_v61 = vadd.f32 1.0, %v2419_v59 }
 0x957   : > { %v1370_v62 = vmul.f32 %v1368_v61, %v1354_v60 }
 0x959   : > { %2293 = vmatmul.msk.f32.gmra.mxu1 %vm1383_vm12, %v1370_v62 }
 0x9bc   : > { %v1419_v63 = vpop.xlane.xlu2 %1418 }
 0x9bd   : > { %v1423_v0 = vmul.f32 %v1419_v63, %v2643_v47 }
 0x9bf   : > { %v1425_v1 = vsub.f32 %v1413_v53, %v1423_v0 }
 0x9c1   : > { %v1427_v2 = vmul.f32 %v1425_v1, %v1425_v1 }
 0x9c3   : > { %v1429_v3 = vsel %vm786_vm8, %v1427_v2, 0.0 }
 0x9c4   : > { %1430 = vadd.xlane.f32.xlu1 %v1429_v3 }
 0x9d6   : > { %v1410_v4 = vpop.f32.mrf.mxu1 }
 0x9d7   : > { %v1411_v5 = vadd.f32 %v2379_v48, %v1410_v4 }
 0x9d9   : > { %v1414_v6 = vadd.f32 %v1411_v5, %v1315_v41  ;;  %v2382_v41 = vld [vmem:[%s3060_s9 + $0x1] ss:$0 sm:$0xff] }
 0x9db   : > { %v1420_v7 = vsel %vm786_vm8, %v1414_v6, 0.0 }
 0x9dc   : > { %1421 = vadd.xlane.f32.xlu0 %v1420_v7 }
 0xa37   : > { %v1431_v11 = vpop.xlane.xlu1 %1430 }
 0xa38   : > { %v1435_v12 = vmul.f32 %v1431_v11, %v2643_v47 }
 0xa3a   : > { %v1437_v13 = vadd.f32 1e-12, %v1435_v12 }
 0xa3c   : > { %2420 = vrsqrt.f32 %v1437_v13  ;;  %vm1445_vm14 = vweird.f32 %v1437_v13 }
 0xa42   : > { %v2421_v14 = vpop.eup %2420 }
 0xa43   : > { %v1440_v15 = vmul.f32 %v2421_v14, %v1437_v13  ;;  %vm1446_vm13 = vweird.f32 %v2421_v14 }
 0xa44   : > { %vm1447_vm15 = vmor %vm1445_vm14, %vm1446_vm13 }
 0xa45   : > { %v1441_v16 = vmul.f32 %v2421_v14, %v1440_v15 }
 0xa47   : > { %v1442_v17 = vmul.f32 0.5, %v1441_v16 }
 0xa49   : > { %v1443_v18 = vsub.f32 1.5, %v1442_v17 }
 0xa4b   : > { %v1444_v20 = vmul.f32 %v2421_v14, %v1443_v18 }
 0xa4d   : > { %v1448_v23 = vsel %vm1447_vm15, %v2421_v14, %v1444_v20 }
 0xa4e   : > { %v1459_v25 = vmul.f32 %v1448_v23, %v1425_v1 }
 0xa4f   : > { %v1422_v28 = vpop.xlane.xlu0 %1421 }
 0xa50   : > { %v1464_v30 = vmul.f32 %v2380_v22, %v1459_v25  ;;  %v1424_v32 = vmul.f32 %v1422_v28, %v2643_v47 }
 0xa52   : > { %v1426_v33 = vsub.f32 %v1414_v6, %v1424_v32  ;;  %v2857_v34 = vadd.f32 %v2381_v27, %v1464_v30 }
 0xa54   : > { %2299 = vmatmul.msk.f32.vlgmr.msrb.gmra.mxu2 %vm786_vm8, %v2857_v34  ;;  %v1428_v35 = vmul.f32 %v1426_v33, %v1426_v33 }
 0xa56   : > { %v1432_v24 = vsel %vm786_vm8, %v1428_v35, 0.0 }
 0xa57   : > { %1433 = vadd.xlane.f32.xlu2 %v1432_v24 }
 0xaca   : > { %v1434_v36 = vpop.xlane.xlu2 %1433 }
 0xacb   : > { %v1436_v38 = vmul.f32 %v1434_v36, %v2643_v47 }
 0xacd   : > { %v1438_v39 = vadd.f32 1e-12, %v1436_v38 }
 0xacf   : > { %2422 = vrsqrt.f32 %v1438_v39  ;;  %vm1455_vm3 = vweird.f32 %v1438_v39 }
 0xad5   : > { %v2423_v42 = vpop.eup %2422 }
 0xad6   : > { %v1450_v43 = vmul.f32 %v2423_v42, %v1438_v39  ;;  %vm1456_vm2 = vweird.f32 %v2423_v42 }
 0xad7   : > { %v1504_v44 = vpop.f32.mrf.mxu2  ;;  %vm1457_vm4 = vmor %vm1455_vm3, %vm1456_vm2 }
 0xad8   : > { %v1451_v45 = vmul.f32 %v2423_v42, %v1450_v43  ;;  %v2866_v48 = vadd.f32 %v2382_v41, %v1504_v44 }
 0xada   : > { %v1452_v49 = vmul.f32 0.5, %v1451_v45  ;;  %1670 = vrot.lane.b32.xlu2 %v2866_v48, %s2468_s26  ;;  %1511 = vrot.lane.b32.xlu0 %v2866_v48, %s2467_s3 }
 0xadc   : > { %v1453_v29 = vsub.f32 1.5, %v1452_v49 }
 0xade   : > { %v1454_v50 = vmul.f32 %v2423_v42, %v1453_v29 }
 0xae0   : > { %v1458_v51 = vsel %vm1457_vm4, %v2423_v42, %v1454_v50 }
 0xae1   : > { %v1460_v52 = vmul.f32 %v1458_v51, %v1426_v33 }
 0xae2   : > { %1668 = vrot.lane.b32.xlu0 %v2866_v48, %s2469_s1 }
 0xae3   : > { %v1465_v53 = vmul.f32 %v2380_v22, %v1460_v52 }
 0xae5   : > { %v2874_v54 = vadd.f32 %v2381_v27, %v1465_v53 }
 0xae7   : > { %2300 = vmatmul.msk.f32.gmra.mxu2 %vm786_vm8, %v2874_v54 }
 0xb34   : > { %v1671_v55 = vpop.permute.xlu2 %1670 }
 0xb35   : > { %2307 = vmatpush.xpose.msk.msra.mxu1 %vm888_vm0, %v1671_v55 }
 0xb4c   : > { %v1512_v56 = vpop.permute.xlu0 %1511 }
 0xb4d   : > { %2301 = vmatpush.xpose.msk.msrb.mxu0 %vm888_vm0, %v1512_v56 }
 0xb50   : > { %2302 = vmatmul.msk.f32.vlgmr.msrb.gmra.mxu0 %vm888_vm0, %v2866_v48 }
 0xb54   : > { %v1669_v57 = vpop.permute.xlu0 %1668 }
 0xb55   : > { %2308 = vmatmul.msk.f32.vlgmr.msra.gmra.mxu1 %vm888_vm0, %v1669_v57 }
 0xb6a   : > { %v1507_v58 = vpop.f32.mrf.mxu2 }
 0xb6b   : > { %v2883_v59 = vadd.f32 %v2382_v41, %v1507_v58 }
 0xb6d   : > { %1538 = vrot.lane.b32.xlu1 %v2883_v59, %s2467_s3  ;;  %1698 = vrot.lane.b32.xlu0 %v2883_v59, %s2468_s26  ;;  %s3092_s3 = smov 64   ;;  %s3093_s26 = smov 48  }
 0xb75   : > { %1696 = vrot.lane.b32.xlu1 %v2883_v59, %s2469_s1 }
 0xbcd   : > { %v1534_v60 = vpop.f32.mrf.mxu0 }
 0xbce   : > { %v1564_v61 = vmul.f32 0.25, %v1534_v60 }
 0xbd0   : > { %v1566_v62 = vadd.f32 %v1564_v61, %v2711_v40 }
 0xbd2   : > { %v1693_v63 = vpop.f32.mrf.mxu1  ;;  %v1568_v0 = vsel %vm950_vm1, %v1566_v62, -inf }
 0xbd3   : > { %v1724_v1 = vmul.f32 0.25, %v1693_v63  ;;  %1569 = vmax.xlane.f32.xlu2 %v1568_v0 }
 0xbd5   : > { %v1726_v2 = vadd.f32 %v1724_v1, %v2711_v40 }
 0xbd7   : > { %v1728_v3 = vsel %vm950_vm1, %v1726_v2, -inf }
 0xbd8   : > { %1729 = vmax.xlane.f32.xlu0 %v1728_v3 }
 0xbdf   : > { %v1539_v4 = vpop.permute.xlu1 %1538  ;;  %v1699_v5 = vpop.permute.xlu0 %1698 }
 0xbe0   : > { %2303 = vmatpush.xpose.msk.msrb.mxu3 %vm888_vm0, %v1539_v4 }
 0xbe3   : > { %2304 = vmatmul.msk.f32.vlgmr.msrb.gmra.mxu3 %vm888_vm0, %v2883_v59 }
 0xbe4   : > { %2309 = vmatpush.xpose.msk.msra.mxu3 %vm888_vm0, %v1699_v5 }
 0xbe7   : > { %v1697_v6 = vpop.permute.xlu1 %1696 }
 0xbeb   : > { %2310 = vmatmul.msk.f32.vlgmr.msra.gmra.mxu3 %vm888_vm0, %v1697_v6 }
 0xc46   : > { %v1570_v7 = vpop.xlane.xlu2 %1569 }
 0xc47   : > { %v1574_v31 = vsub.f32 %v1566_v62, %v1570_v7 }
 0xc49   : > { %v1576_v8 = vmul.f32 1.442695, %v1574_v31 }
 0xc4b   : > { %2424 = vpow2.f32 %v1576_v8  ;;  %v1730_v10 = vpop.xlane.xlu0 %1729 }
 0xc4c   : > { %v1734_v11 = vsub.f32 %v1726_v2, %v1730_v10 }
 0xc4e   : > { %v1736_v12 = vmul.f32 1.442695, %v1734_v11 }
 0xc50   : > { %2426 = vpow2.f32 %v1736_v12 }
 0xc51   : > { %v2425_v40 = vpop.eup %2424 }
 0xc52   : > { %v1580_v9 = vsel %vm950_vm1, %v2425_v40, 0.0 }
 0xc53   : > { %1581 = vadd.xlane.f32.xlu0 %v1580_v9 }
 0xc56   : > { %v2907_v20 = vpop.eup %2426 }
 0xc57   : > { %v1740_v25 = vsel %vm950_vm1, %v2907_v20, 0.0 }
 0xc66   : > { %v1561_v13 = vpop.f32.mrf.mxu3 }
 0xc67   : > { %v1565_v14 = vmul.f32 0.25, %v1561_v13  ;;  %1616 = vrot.lane.b32.xlu0 %v2866_v48, %s3092_s3 }
 0xc69   : > { %v1567_v15 = vadd.f32 %v1565_v14, %v2715_v46 }
 0xc6b   : > { %v1571_v16 = vsel %vm950_vm1, %v1567_v15, -inf }
 0xc6c   : > { %1572 = vmax.xlane.f32.xlu1 %v1571_v16 }
 0xc6e   : > { %v1721_v17 = vpop.f32.mrf.mxu3 }
 0xc6f   : > { %v1725_v18 = vmul.f32 0.25, %v1721_v17  ;;  %1802 = vrot.lane.b32.xlu0 %v2883_v59, %s3093_s26 }
 0xc71   : > { %v1727_v22 = vadd.f32 %v1725_v18, %v2715_v46 }
 0xc73   : > { %v1731_v23 = vsel %vm950_vm1, %v1727_v22, -inf }
 0xc74   : > { %1732 = vmax.xlane.f32.xlu2 %v1731_v23  ;;  %1741 = vadd.xlane.f32.xlu1 %v1740_v25 }
 0xcc6   : > { %v1582_v27 = vpop.xlane.xlu0 %1581 }
 0xcc7   : > { %2428 = vrcp.f32 %v1582_v27  ;;  %v1597_v33 = vand.u32 2147483648, %v1582_v27  ;;  %v1595_v24 = vand.u32 2147483647, %v1582_v27  ;;  %vm1591_vm6 = vweird.f32 %v1582_v27 }
 0xcc9   : > { %v1598_v46 = vor.u32 1.1754944e-38, %v1597_v33  ;;  %vm1596_vm9 = vcmp.eq.f32.partialorder %v1595_v24, 8.507059e+37  ;;  %v2316_v24 = vld [vmem:[%s3061_s10 + $0x38] sm:$0xff] }
 0xcca   : > { %1866 = vmatpush.msrb.mxu1 %v2316_v24 }
 0xccd   : > { %v2429_v28 = vpop.eup %2428 }
 0xcce   : > { %v1587_v30 = vmul.f32 %v2429_v28, %v1582_v27  ;;  %vm1592_vm5 = vweird.f32 %v2429_v28 }
 0xccf   : > { %vm1593_vm7 = vmor %vm1591_vm6, %vm1592_vm5 }
 0xcd0   : > { %v1588_v32 = vsub.f32 1.0, %v1587_v30 }
 0xcd2   : > { %v1589_v35 = vmul.f32 %v2429_v28, %v1588_v32 }
 0xcd4   : > { %v1590_v36 = vadd.f32 %v2429_v28, %v1589_v35 }
 0xcd6   : > { %v1594_v38 = vsel %vm1593_vm7, %v2429_v28, %v1590_v36  ;;  %v2315_v36 = vld [vmem:[%s3061_s10 + $0x30] sm:$0xff] }
 0xcd7   : > { %v1599_v39 = vsel %vm1596_vm9, %v1598_v46, %v1594_v38  ;;  %v2314_v46 = vld [vmem:[%s3061_s10 + $0x28] sm:$0xff]  ;;  %1867 = vmatpush.msrb.mxu1 %v2315_v36 }
 0xcd8   : > { %v1600_v41 = vmul.f32 %v2425_v40, %v1599_v39 }
 0xcd9   : > { %v1617_v42 = vpop.permute.xlu0 %1616  ;;  %1868 = vmatpush.msrb.mxu1 %v2314_v46 }
 0xcda   : > { %1637 = vmatpush.msra.mxu2 %v1617_v42  ;;  %v2313_v42 = vld [vmem:[%s3061_s10 + $0x20] sm:$0xff] }
 0xcdb   : > { %2305 = vmatmul.msk.f32.vlgmr.msra.gmra.mxu2 %vm950_vm1, %v1600_v41  ;;  %1869 = vmatpush.msrb.mxu1 %v2313_v42  ;;  %v2333_v42 = vld [vmem:[%s3067_s16 + $0x60] sm:$0xff] }
 0xcdf   : > { %v1573_v43 = vpop.xlane.xlu1 %1572 }
 0xce0   : > { %v1575_v44 = vsub.f32 %v1567_v15, %v1573_v43 }
 0xce1   : > { %v1803_v27 = vpop.permute.xlu0 %1802 }
 0xce2   : > { %v1578_v45 = vmul.f32 1.442695, %v1575_v44 }
 0xce4   : > { %2430 = vpow2.f32 %v1578_v45 }
 0xce7   : > { %v1733_v49 = vpop.xlane.xlu2 %1732  ;;  %v1742_v56 = vpop.xlane.xlu1 %1741 }
 0xce8   : > { %v1735_v29 = vsub.f32 %v1727_v22, %v1733_v49  ;;  %v1757_v63 = vand.u32 2147483648, %v1742_v56  ;;  %vm1751_vm11 = vweird.f32 %v1742_v56  ;;  %v1755_v0 = vand.u32 2147483647, %v1742_v56 }
 0xcea   : > { %v2431_v50 = vpop.eup %2430  ;;  %v1738_v51 = vmul.f32 1.442695, %v1735_v29  ;;  %v1758_v3 = vor.u32 1.1754944e-38, %v1757_v63  ;;  %vm1756_vm14 = vcmp.eq.f32.partialorder %v1755_v0, 8.507059e+37  ;;  %v2383_v29 = vld [vmem:[%s3062_s11 + $0x1] ss:$0 sm:$0xff] }
 0xceb   : > { %v1583_v52 = vsel %vm950_vm1, %v2431_v50, 0.0 }
 0xcec   : > { %2432 = vpow2.f32 %v1738_v51  ;;  %1584 = vadd.xlane.f32.xlu2 %v1583_v52 }
 0xced   : > { %2434 = vrcp.f32 %v1742_v56 }
 0xcf2   : > { %v2915_v53 = vpop.eup %2432 }
 0xcf3   : > { %v1743_v55 = vsel %vm950_vm1, %v2915_v53, 0.0  ;;  %v2435_v57 = vpop.eup %2434 }
 0xcf4   : > { %1744 = vadd.xlane.f32.xlu1 %v1743_v55  ;;  %v1747_v58 = vmul.f32 %v2435_v57, %v1742_v56  ;;  %vm1752_vm10 = vweird.f32 %v2435_v57 }
 0xcf5   : > { %vm1753_vm13 = vmor %vm1751_vm11, %vm1752_vm10 }
 0xcf6   : > { %v1748_v60 = vsub.f32 1.0, %v1747_v58 }
 0xcf8   : > { %v1749_v61 = vmul.f32 %v2435_v57, %v1748_v60 }
 0xcfa   : > { %v1750_v62 = vadd.f32 %v2435_v57, %v1749_v61 }
 0xcfc   : > { %v1754_v2 = vsel %vm1753_vm13, %v2435_v57, %v1750_v62 }
 0xd04   : > { %1776 = vrot.lane.b32.xlu2 %v2866_v48, %s3093_s26  ;;  %v1759_v48 = vsel %vm1756_vm14, %v1758_v3, %v1754_v2 }
 0xd05   : > { %v1760_v6 = vmul.f32 %v2907_v20, %v1759_v48 }
 0xd0d   : > { %1642 = vrot.lane.b32.xlu1 %v2883_v59, %s3092_s3  ;;  %s664_s3 = scalar_lea.vmem %s3071_s20, %s3097_s25 }
 0xd5e   : > { %v1639_v35 = vpop.f32.mrf.mxu2 }
 0xd5f   : > { %v1585_v1 = vpop.xlane.xlu2 %1584 }
 0xd60   : > { %2436 = vrcp.f32 %v1585_v1  ;;  %v1612_v12 = vand.u32 2147483648, %v1585_v1  ;;  %vm1606_vm2 = vweird.f32 %v1585_v1  ;;  %v1610_v13 = vand.u32 2147483647, %v1585_v1 }
 0xd62   : > { %v1613_v16 = vor.u32 1.1754944e-38, %v1612_v12  ;;  %vm1611_vm4 = vcmp.eq.f32.partialorder %v1610_v13, 8.507059e+37  ;;  %v2384_v13 = vld [vmem:[%s3063_s12 + $0x1] ss:$0 sm:$0xff] }
 0xd66   : > { %v2437_v4 = vpop.eup %2436 }
 0xd67   : > { %v1777_v59 = vpop.permute.xlu2 %1776  ;;  %v1745_v5 = vpop.xlane.xlu1 %1744  ;;  %v1602_v7 = vmul.f32 %v2437_v4, %v1585_v1  ;;  %vm1607_vm15 = vweird.f32 %v2437_v4 }
 0xd68   : > { %2438 = vrcp.f32 %v1745_v5  ;;  %1797 = vmatpush.msrb.mxu2 %v1777_v59  ;;  %vm1608_vm3 = vmor %vm1606_vm2, %vm1607_vm15  ;;  %v1772_v20 = vand.u32 2147483648, %v1745_v5  ;;  %vm1766_vm6 = vweird.f32 %v1745_v5  ;;  %v1770_v22 = vand.u32 2147483647, %v1745_v5  ;;  %v2323_v59 = vld [vmem:[%s3065_s14 + $0x28] sm:$0xff] }
 0xd69   : > { %2311 = vmatmul.msk.f32.vlgmr.msrb.gmra.mxu2 %vm950_vm1, %v1760_v6  ;;  %v1603_v31 = vsub.f32 1.0, %v1602_v7 }
 0xd6a   : > { %v1773_v30 = vor.u32 1.1754944e-38, %v1772_v20  ;;  %vm1771_vm9 = vcmp.eq.f32.partialorder %v1770_v22, 8.507059e+37 }
 0xd6b   : > { %v1604_v40 = vmul.f32 %v2437_v4, %v1603_v31 }
 0xd6d   : > { %v1605_v10 = vadd.f32 %v2437_v4, %v1604_v40 }
 0xd6e   : > { %v2439_v8 = vpop.eup %2438 }
 0xd6f   : > { %v1762_v9 = vmul.f32 %v2439_v8, %v1745_v5  ;;  %v1609_v14 = vsel %vm1608_vm3, %v2437_v4, %v1605_v10  ;;  %vm1767_vm5 = vweird.f32 %v2439_v8  ;;  %v2324_v4 = vld [vmem:[%s3065_s14 + $0x30] sm:$0xff]  ;;  %v2322_v5 = vld [vmem:[%s3065_s14 + $0x20] sm:$0xff] }
 0xd70   : > { %v1614_v17 = vsel %vm1611_vm4, %v1613_v16, %v1609_v14  ;;  %vm1768_vm7 = vmor %vm1766_vm6, %vm1767_vm5  ;;  %v2385_v16 = vld [vmem:[%s3064_s13 + $0x1] ss:$0 sm:$0xff] }
 0xd71   : > { %v1763_v11 = vsub.f32 1.0, %v1762_v9  ;;  %v1615_v25 = vmul.f32 %v2431_v50, %v1614_v17 }
 0xd73   : > { %v1764_v15 = vmul.f32 %v2439_v8, %v1763_v11 }
 0xd75   : > { %v1765_v18 = vadd.f32 %v2439_v8, %v1764_v15 }
 0xd77   : > { %v1769_v28 = vsel %vm1768_vm7, %v2439_v8, %v1765_v18 }
 0xd78   : > { %v1774_v32 = vsel %vm1771_vm9, %v1773_v30, %v1769_v28 }
 0xd79   : > { %v1775_v33 = vmul.f32 %v2915_v53, %v1774_v32 }
 0xd7f   : > { %v1643_v23 = vpop.permute.xlu1 %1642 }
 0xd80   : > { %1663 = vmatpush.msra.mxu0 %v1643_v23 }
 0xd81   : > { %2306 = vmatmul.msk.f32.vlgmr.msra.gmra.mxu0 %vm950_vm1, %v1615_v25 }
 0xd82   : > { %1823 = vmatpush.msrb.mxu0 %v1803_v27 }
 0xd89   : > { %2312 = vmatmul.msk.f32.vlgmr.msrb.gmra.mxu0 %vm950_vm1, %v1775_v33 }
 0xdec   : > { %v1799_v38 = vpop.f32.mrf.mxu2 }
 0xded   : > { %1830 = vrot.lane.b32.xlu2 %v1799_v38, %s3094_s0  ;;  %v2336_v38 = vld [vmem:[%s3067_s16 + $0x78] sm:$0xff] }
 0xdee   : > { %2022 = vmatpush.msra.mxu2 %v2336_v38 }
 0xdfe   : > { %v1665_v39 = vpop.f32.mrf.mxu0 }
 0xe06   : > { %v1825_v41 = vpop.f32.mrf.mxu0 }
 0xe07   : > { %1832 = vrot.lane.b32.xlu0 %v1825_v41, %s3094_s0  ;;  %v2334_v41 = vld [vmem:[%s3067_s16 + $0x68] sm:$0xff] }
 0xe47   : > { %v1831_v43 = vpop.permute.xlu2 %1830 }
 0xe48   : > { %v1836_v44 = vsel %vm888_vm0, %v1639_v35, %v1831_v43  ;;  %v2332_v43 = vld [vmem:[%s3067_s16 + $0x58] sm:$0xff] }
 0xe49   : > { %2318 = vmatmul.msk.f32.vlgmr.msrb.gmra.mxu1 %vm786_vm8, %v1836_v44  ;;  %v2331_v44 = vld [vmem:[%s3067_s16 + $0x50] sm:$0xff] }
 0xe79   : > { %v1833_v45 = vpop.permute.xlu0 %1832 }
 0xe7a   : > { %v1837_v49 = vsel %vm888_vm0, %v1665_v39, %v1833_v45  ;;  %v2335_v39 = vld [vmem:[%s3067_s16 + $0x70] sm:$0xff]  ;;  %v2330_v45 = vld [vmem:[%s3067_s16 + $0x48] sm:$0xff] }
 0xe7b   : > { %2319 = vmatmul.msk.f32.gmra.mxu1 %vm786_vm8, %v1837_v49  ;;  %2023 = vmatpush.msra.mxu2 %v2335_v39  ;;  %v2329_v49 = vld [vmem:[%s3067_s16 + $0x40] sm:$0xff] }
 0xe7d   : > { %2024 = vmatpush.msra.mxu2 %v2334_v41 }
 0xe7f   : > { %2025 = vmatpush.msra.mxu2 %v2333_v42 }
 0xe81   : > { %2026 = vmatpush.msra.mxu2 %v2332_v43 }
 0xe83   : > { %2027 = vmatpush.msra.mxu2 %v2331_v44 }
 0xe85   : > { %2028 = vmatpush.msra.mxu2 %v2330_v45 }
 0xe87   : > { %2029 = vmatpush.msra.mxu2 %v2329_v49 }
 0xec6   : > { %v1871_v50 = vpop.f32.mrf.mxu1 }
 0xec7   : > { %v1872_v51 = vadd.f32 %v2383_v29, %v1871_v50 }
 0xec9   : > { %v1877_v52 = vadd.f32 %v1872_v51, %v2857_v34 }
 0xecb   : > { %v1883_v53 = vsel %vm786_vm8, %v1877_v52, 0.0 }
 0xecc   : > { %1884 = vadd.xlane.f32.xlu2 %v1883_v53 }
 0xef8   : > { %v1874_v55 = vpop.f32.mrf.mxu1 }
 0xef9   : > { %v1875_v56 = vadd.f32 %v2383_v29, %v1874_v55  ;;  %v2386_v29 = vld [vmem:[%s3066_s15 + $0x1] ss:$0 sm:$0xff] }
 0xefb   : > { %v1878_v57 = vadd.f32 %v1875_v56, %v2874_v54  ;;  %v2325_v54 = vld [vmem:[%s3065_s14 + $0x38] sm:$0xff] }
 0xefc   : > { %1965 = vmatpush.msrb.mxu3 %v2325_v54 }
 0xefd   : > { %v1886_v58 = vsel %vm786_vm8, %v1878_v57, 0.0 }
 0xefe   : > { %1887 = vadd.xlane.f32.xlu1 %v1886_v58  ;;  %1966 = vmatpush.msrb.mxu3 %v2324_v4 }
 0xf00   : > { %1967 = vmatpush.msrb.mxu3 %v2323_v59 }
 0xf02   : > { %1968 = vmatpush.msrb.mxu3 %v2322_v5 }
 0xf3f   : > { %v1885_v60 = vpop.xlane.xlu2 %1884 }
 0xf40   : > { %v1889_v61 = vmul.f32 %v1885_v60, %v2643_v47 }
 0xf42   : > { %v1891_v62 = vsub.f32 %v1877_v52, %v1889_v61 }
 0xf44   : > { %v1893_v63 = vmul.f32 %v1891_v62, %v1891_v62 }
 0xf46   : > { %v1895_v0 = vsel %vm786_vm8, %v1893_v63, 0.0 }
 0xf47   : > { %1896 = vadd.xlane.f32.xlu0 %v1895_v0 }
 0xf71   : > { %v1888_v1 = vpop.xlane.xlu1 %1887 }
 0xf72   : > { %v1890_v34 = vmul.f32 %v1888_v1, %v2643_v47 }
 0xf74   : > { %v1892_v2 = vsub.f32 %v1878_v57, %v1890_v34 }
 0xf76   : > { %v1894_v3 = vmul.f32 %v1892_v2, %v1892_v2 }
 0xf78   : > { %v1898_v48 = vsel %vm786_vm8, %v1894_v3, 0.0 }
 0xf79   : > { %1899 = vadd.xlane.f32.xlu2 %v1898_v48 }
 0xfba   : > { %v1897_v6 = vpop.xlane.xlu0 %1896 }
 0xfbb   : > { %v1901_v7 = vmul.f32 %v1897_v6, %v2643_v47  ;;  %v2387_v6 = vld [vmem:[%s3068_s17 + $0x1] ss:$0 sm:$0xff] }
 0xfbd   : > { %v1903_v31 = vadd.f32 1e-12, %v1901_v7 }
 0xfbf   : > { %2440 = vrsqrt.f32 %v1903_v31  ;;  %vm1911_vm1 = vweird.f32 %v1903_v31 }
 0xfc5   : > { %v2441_v8 = vpop.eup %2440 }
 0xfc6   : > { %v1906_v40 = vmul.f32 %v2441_v8, %v1903_v31  ;;  %vm1912_vm0 = vweird.f32 %v2441_v8 }
 0xfc7   : > { %vm1913_vm10 = vmor %vm1911_vm1, %vm1912_vm0 }
 0xfc8   : > { %v1907_v9 = vmul.f32 %v2441_v8, %v1906_v40 }
 0xfca   : > { %v1908_v10 = vmul.f32 0.5, %v1907_v9 }
 0xfcc   : > { %v1909_v11 = vsub.f32 1.5, %v1908_v10 }
 0xfce   : > { %v1910_v12 = vmul.f32 %v2441_v8, %v1909_v11 }
 0xfd0   : > { %v1914_v14 = vsel %vm1913_vm10, %v2441_v8, %v1910_v12 }
 0xfd1   : > { %v1925_v15 = vmul.f32 %v1914_v14, %v1891_v62 }
 0xfd3   : > { %v1930_v17 = vmul.f32 %v2384_v13, %v1925_v15 }
 0xfd5   : > { %v2976_v18 = vadd.f32 %v2385_v16, %v1930_v17 }
 0xfd7   : > { %2327 = vmatmul.msk.f32.vlgmr.msrb.gmra.mxu3 %vm786_vm8, %v2976_v18 }
 0xfec   : > { %v1900_v20 = vpop.xlane.xlu2 %1899 }
 0xfed   : > { %v1902_v22 = vmul.f32 %v1900_v20, %v2643_v47 }
 0xfef   : > { %v1904_v23 = vadd.f32 1e-12, %v1902_v22  ;;  %v2099_v22 = vperm.slane %v2708_v37, 0 }
 0xff1   : > { %2442 = vrsqrt.f32 %v1904_v23  ;;  %vm1921_vm13 = vweird.f32 %v1904_v23 }
 0xff7   : > { %v2443_v25 = vpop.eup %2442 }
 0xff8   : > { %v1916_v27 = vmul.f32 %v2443_v25, %v1904_v23  ;;  %vm1922_vm11 = vweird.f32 %v2443_v25 }
 0xff9   : > { %vm1923_vm14 = vmor %vm1921_vm13, %vm1922_vm11 }
 0xffa   : > { %v1917_v28 = vmul.f32 %v2443_v25, %v1916_v27 }
 0xffc   : > { %v1918_v30 = vmul.f32 0.5, %v1917_v28 }
 0xffe   : > { %v1919_v32 = vsub.f32 1.5, %v1918_v30  ;;  %v2106_v30 = vperm.slane %v2708_v37, 1 }
0x1000   : > { %v1920_v33 = vmul.f32 %v2443_v25, %v1919_v32 }
0x1002   : > { %v1924_v35 = vsel %vm1923_vm14, %v2443_v25, %v1920_v33  ;;  %vm2171_vm14 = vcmask 1041409  }
0x1003   : > { %v1926_v24 = vmul.f32 %v1924_v35, %v1892_v2 }
0x1005   : > { %v1931_v36 = vmul.f32 %v2384_v13, %v1926_v24  ;;  %v2101_v13 = vshrl.u32 %v686_v19, 7 }
0x1007   : > { %v1936_v46 = vadd.f32 %v2385_v16, %v1931_v36  ;;  %2370 = vset.pattern.permute.xlu1 %v2101_v13  ;;  %2369 = vset.pattern.permute.xlu2 %v2101_v13 }
0x1008   : > { %2371 = vset.pattern.permute.xlu0 %v2101_v13 }
0x1009   : > { %2328 = vmatmul.msk.f32.gmra.mxu3 %vm786_vm8, %v1936_v46 }
0x105a   : > { %v1970_v50 = vpop.f32.mrf.mxu3 }
0x105b   : > { %v1971_v51 = vadd.f32 %v2386_v29, %v1970_v50  ;;  %v2389_v50 = vld [vmem:[%s3070_s19 + $0x1] ss:$0 sm:$0xff] }
0x105d   : > { %v1978_v52 = vmul.f32 0.044715, %v1971_v51  ;;  %v1976_v60 = vmul.f32 0.5, %v1971_v51 }
0x105f   : > { %v1980_v53 = vmul.f32 %v1978_v52, %v1971_v51 }
0x1061   : > { %v1982_v55 = vmul.f32 %v1980_v53, %v1971_v51 }
0x1063   : > { %v1984_v56 = vadd.f32 %v1982_v55, %v1971_v51 }
0x1065   : > { %v1986_v57 = vmul.f32 0.7978846, %v1984_v56 }
0x1067   : > { %2444 = vtanh.f32 %v1986_v57 }
0x106d   : > { %v2445_v58 = vpop.eup %2444 }
0x106e   : > { %v1990_v61 = vadd.f32 1.0, %v2445_v58 }
0x1070   : > { %v1992_v62 = vmul.f32 %v1990_v61, %v1976_v60 }
0x1072   : > { %2338 = vmatmul.msk.f32.vlgmr.msra.gmra.mxu2 %vm1383_vm12, %v1992_v62 }
0x108c   : > { %v1973_v63 = vpop.f32.mrf.mxu3 }
0x108d   : > { %v1974_v0 = vadd.f32 %v2386_v29, %v1973_v63 }
0x108f   : > { %v1979_v1 = vmul.f32 0.044715, %v1974_v0  ;;  %v1977_v4 = vmul.f32 0.5, %v1974_v0 }
0x1091   : > { %v1981_v34 = vmul.f32 %v1979_v1, %v1974_v0 }
0x1093   : > { %v1983_v2 = vmul.f32 %v1981_v34, %v1974_v0 }
0x1095   : > { %v1985_v3 = vadd.f32 %v1983_v2, %v1974_v0 }
0x1097   : > { %v1987_v48 = vmul.f32 0.7978846, %v1985_v3 }
0x1099   : > { %2446 = vtanh.f32 %v1987_v48 }
0x109f   : > { %v2447_v54 = vpop.eup %2446 }
0x10a0   : > { %v1991_v59 = vadd.f32 1.0, %v2447_v54 }
0x10a2   : > { %v1993_v5 = vmul.f32 %v1991_v59, %v1977_v4 }
0x10a4   : > { %2339 = vmatmul.msk.f32.gmra.mxu2 %vm1383_vm12, %v1993_v5  ;;  %vm2129_vm12 = vcmask 58368  }
0x10a5   : > { %v2130_v14 = vsel %vm2129_vm12, %v2708_v37, 0.0  ;;  %v2388_v37 = vld [vmem:[%s3069_s18 + $0x1] ss:$0 sm:$0xff]  ;;  %vm2174_vm12 = vcmask 254976  }
0x10f5   : > { %v2031_v7 = vpop.f32.mrf.mxu2 }
0x10f6   : > { %v2032_v31 = vadd.f32 %v2387_v6, %v2031_v7 }
0x10f8   : > { %v2037_v8 = vadd.f32 %v2032_v31, %v2976_v18 }
0x10fa   : > { %v2043_v40 = vsel %vm786_vm8, %v2037_v8, 0.0 }
0x10fb   : > { %2044 = vadd.xlane.f32.xlu0 %v2043_v40 }
0x1103   : > { %2131 = vadd.xlane.f32.xlu0 %v2130_v14 }
0x1127   : > { %v2034_v9 = vpop.f32.mrf.mxu2 }
0x1128   : > { %v2035_v10 = vadd.f32 %v2387_v6, %v2034_v9 }
0x112a   : > { %v2038_v11 = vadd.f32 %v2035_v10, %v1936_v46 }
0x112c   : > { %v2046_v12 = vsel %vm786_vm8, %v2038_v11, 0.0 }
0x112d   : > { %2047 = vadd.xlane.f32.xlu1 %v2046_v12 }
0x116e   : > { %v2045_v15 = vpop.xlane.xlu0 %2044 }
0x116f   : > { %v2049_v16 = vmul.f32 %v2045_v15, %v2643_v47 }
0x1171   : > { %v2051_v17 = vsub.f32 %v2037_v8, %v2049_v16 }
0x1173   : > { %v2053_v18 = vmul.f32 %v2051_v17, %v2051_v17 }
0x1175   : > { %v2055_v20 = vsel %vm786_vm8, %v2053_v18, 0.0 }
0x1176   : > { %2056 = vadd.xlane.f32.xlu1 %v2055_v20  ;;  %v2132_v51 = vpop.xlane.xlu0 %2131 }
0x1177   : > { %v2133_v55 = vmax.f32 %v2132_v51, 1e-09 }
0x1179   : > { %v2135_v57 = vrot.slane %v2133_v55, 1  ;;  %vm2143_vm7 = vweird.f32 %v2133_v55  ;;  %v2149_v18 = vand.u32 2147483648, %v2133_v55 }
0x117b   : > { %vm2158_vm0 = vweird.f32 %v2135_v57  ;;  %v2164_v20 = vand.u32 2147483648, %v2135_v57 }
0x118f   : > { %2104 = vperm.xlu1 %2370, %v2099_v22  }
0x11a0   : > { %v2048_v23 = vpop.xlane.xlu1 %2047 }
0x11a1   : > { %v2050_v19 = vmul.f32 %v2048_v23, %v2643_v47 }
0x11a3   : > { %v2052_v25 = vsub.f32 %v2038_v11, %v2050_v19 }
0x11a5   : > { %v2054_v27 = vmul.f32 %v2052_v25, %v2052_v25 }
0x11a7   : > { %v2058_v28 = vsel %vm786_vm8, %v2054_v27, 0.0 }
0x11a8   : > { %2059 = vadd.xlane.f32.xlu2 %v2058_v28 }
0x11c0   : > { %2111 = vperm.xlu2 %2369, %v2106_v30  }
0x11e9   : > { %v2057_v32 = vpop.xlane.xlu1 %2056 }
0x11ea   : > { %v2061_v33 = vmul.f32 %v2057_v32, %v2643_v47  ;;  %v2150_v32 = vor.u32 1.1754944e-38, %v2149_v18 }
0x11ec   : > { %v2063_v35 = vadd.f32 1e-12, %v2061_v33  ;;  %v2165_v33 = vor.u32 1.1754944e-38, %v2164_v20 }
0x11ee   : > { %2448 = vrsqrt.f32 %v2063_v35  ;;  %vm2071_vm2 = vweird.f32 %v2063_v35 }
0x11f4   : > { %v2449_v24 = vpop.eup %2448 }
0x11f5   : > { %v2066_v36 = vmul.f32 %v2449_v24, %v2063_v35  ;;  %vm2072_vm15 = vweird.f32 %v2449_v24 }
0x11f6   : > { %vm2073_vm3 = vmor %vm2071_vm2, %vm2072_vm15 }
0x11f7   : > { %v2067_v46 = vmul.f32 %v2449_v24, %v2066_v36 }
0x11f9   : > { %v2068_v38 = vmul.f32 0.5, %v2067_v46 }
0x11fb   : > { %v2069_v39 = vsub.f32 1.5, %v2068_v38 }
0x11fd   : > { %v2070_v41 = vmul.f32 %v2449_v24, %v2069_v39 }
0x11ff   : > { %v2074_v42 = vsel %vm2073_vm3, %v2449_v24, %v2070_v41 }
0x1200   : > { %v2085_v44 = vmul.f32 %v2074_v42, %v2051_v17 }
0x1201   : > { %v2105_v60 = vpop.permute.xlu1 %2104 }
0x1202   : > { %v2090_v29 = vmul.f32 %v2388_v37, %v2085_v44 }
0x1204   : > { %v2095_v52 = vadd.f32 %v2389_v50, %v2090_v29 }
0x1206   : > { %v2097_v58 = vadd.f32 %v2095_v52, %v2669_v21 }
0x121b   : > { %v2060_v43 = vpop.xlane.xlu2 %2059 }
0x121c   : > { %v2062_v45 = vmul.f32 %v2060_v43, %v2643_v47  ;;  %v2113_v47 = vmul.f32 %v2105_v60, %v2097_v58 }
0x121e   : > { %v2064_v49 = vadd.f32 1e-12, %v2062_v45  ;;  %v2115_v1 = vsel %vm786_vm8, %v2113_v47, 0.0 }
0x121f   : > { %v2116_v54 = vrot.slane %v2115_v1, 4 }
0x1220   : > { %2450 = vrsqrt.f32 %v2064_v49  ;;  %vm2081_vm5 = vweird.f32 %v2064_v49 }
0x1221   : > { %2452 = vrcp.f32 %v2133_v55  ;;  %v2117_v6 = vadd.f32 %v2116_v54, %v2115_v1 }
0x1222   : > { %2454 = vrcp.f32 %v2135_v57 }
0x1223   : > { %v2112_v7 = vpop.permute.xlu2 %2111  ;;  %v2118_v10 = vrot.slane %v2117_v6, 2 }
0x1225   : > { %v2119_v15 = vadd.f32 %v2118_v10, %v2117_v6 }
0x1226   : > { %v2451_v53 = vpop.eup %2450 }
0x1227   : > { %v2076_v56 = vmul.f32 %v2451_v53, %v2064_v49  ;;  %vm2082_vm4 = vweird.f32 %v2451_v53  ;;  %v2453_v34 = vpop.eup %2452  ;;  %v2120_v27 = vrot.slane %v2119_v15, 1 }
0x1228   : > { %vm2083_vm6 = vmor %vm2081_vm5, %vm2082_vm4  ;;  %v2455_v3 = vpop.eup %2454  ;;  %v2139_v4 = vmul.f32 %v2453_v34, %v2133_v55  ;;  %vm2144_vm9 = vweird.f32 %v2453_v34 }
0x1229   : > { %v2077_v61 = vmul.f32 %v2451_v53, %v2076_v56  ;;  %v2154_v59 = vmul.f32 %v2455_v3, %v2135_v57  ;;  %vm2159_vm1 = vweird.f32 %v2455_v3  ;;  %vm3037_vm10 = vmor %vm2143_vm7, %vm2144_vm9  ;;  %v2121_v36 = vadd.f32 %v2120_v27, %v2119_v15 }
0x122a   : > { %v2140_v31 = vsub.f32 1.0, %v2139_v4 }
0x122b   : > { %v2078_v62 = vmul.f32 0.5, %v2077_v61  ;;  %v2155_v40 = vsub.f32 1.0, %v2154_v59 }
0x122c   : > { %v2141_v11 = vmul.f32 %v2453_v34, %v2140_v31 }
0x122d   : > { %v2079_v63 = vsub.f32 1.5, %v2078_v62  ;;  %v2156_v14 = vmul.f32 %v2455_v3, %v2155_v40 }
0x122e   : > { %v2142_v17 = vadd.f32 %v2453_v34, %v2141_v11 }
0x122f   : > { %v2080_v0 = vmul.f32 %v2451_v53, %v2079_v63  ;;  %v2157_v19 = vadd.f32 %v2455_v3, %v2156_v14 }
0x1230   : > { %v2146_v30 = vsel %vm3037_vm10, %v2453_v34, %v2142_v17 }
0x1231   : > { %v2084_v2 = vsel %vm2083_vm6, %v2451_v53, %v2080_v0 }
0x1232   : > { %v2086_v48 = vmul.f32 %v2084_v2, %v2052_v25  ;;  %v2162_v25 = vand.u32 2147483647, %v2135_v57 }
0x1234   : > { %v2091_v21 = vmul.f32 %v2388_v37, %v2086_v48  ;;  %vm2163_vm13 = vcmp.eq.f32.partialorder %v2162_v25, 8.507059e+37 }
0x1236   : > { %v2096_v5 = vadd.f32 %v2389_v50, %v2091_v21 }
0x1238   : > { %v2098_v8 = vadd.f32 %v2096_v5, %v2673_v26  ;;  %v2147_v26 = vand.u32 2147483647, %v2133_v55 }
0x123a   : > { %v2114_v9 = vmul.f32 %v2112_v7, %v2098_v8  ;;  %vm2148_vm11 = vcmp.eq.f32.partialorder %v2147_v26, 8.507059e+37 }
0x123b   : > { %v2151_v38 = vsel %vm2148_vm11, %v2150_v32, %v2146_v30 }
0x123c   : > { %v2122_v12 = vsel %vm786_vm8, %v2114_v9, 0.0  ;;  %vm2160_vm8 = vmor %vm2158_vm0, %vm2159_vm1  ;;  %v2152_v42 = vmul.f32 %v2151_v38, %v2121_v36 }
0x123d   : > { %v2123_v13 = vrot.slane %v2122_v12, 4  ;;  %v2161_v24 = vsel %vm2160_vm8, %v2455_v3, %v2157_v19 }
0x123e   : > { %v2166_v39 = vsel %vm2163_vm13, %v2165_v33, %v2161_v24 }
0x123f   : > { %v2124_v16 = vadd.f32 %v2123_v13, %v2122_v12 }
0x1241   : > { %v2125_v23 = vrot.slane %v2124_v16, 2 }
0x1243   : > { %v2126_v28 = vadd.f32 %v2125_v23, %v2124_v16 }
0x1245   : > { %v2127_v35 = vrot.slane %v2126_v28, 1 }
0x1247   : > { %v2128_v46 = vadd.f32 %v2127_v35, %v2126_v28 }
0x1249   : > { %v2167_v41 = vmul.f32 %v2166_v39, %v2128_v46 }
0x124b   : > { %v2170_v43 = vrot.slane %v2167_v41, 7 }
0x124d   : > { %v2172_v44 = vsel %vm2171_vm14, %v2170_v43, %v2152_v42 }
0x124e   : > { %2175 = vst.msk [vmem:[%s664_s3] sm:$0x3] %vm2174_vm12, %v2172_v44 }
0x124f PF: > { %s3098_s26 = sld [smem:[#allocation2_spill]] }
0x1255   : > { %s30_s1 = sadd.s32 1, %s3098_s26  }
0x1256   : > { %p27_p4 = scmp.ge.s32.totalorder %s30_s1, 4  }
0x1258   :  { %29 = sbr.rel (!%p27_p4) target bundleno = 6 (0x6), region = 148 }

</bundles_post_ra>
